<compile_context>
chip_gen: v7x
topology: tpu7x:2x2x1
jax: 0.10.0
libtpu: 0.0.40
codegen_flags: <defaults>
</compile_context>

<pallas_src>
import math
import functools

import jax
import jax.numpy as jnp
from jax import lax
from jax.experimental import pallas as pl
from jax.experimental.pallas import tpu as pltpu


# ---------------------------------------------------------------------------
# In-kernel helpers
# ---------------------------------------------------------------------------
def _layer_norm(x, w, b, eps=1e-5):
    mu = jnp.mean(x, axis=-1, keepdims=True)
    var = jnp.mean((x - mu) ** 2, axis=-1, keepdims=True)
    return (x - mu) * lax.rsqrt(var + eps) * w + b


# ---------------------------------------------------------------------------
# Pallas kernel: full DecoderLayer forward in one invocation
# ---------------------------------------------------------------------------
def decoder_layer_kernel(B, tgt_ref, mem_ref,
                         wq3_ref, bq3_ref, wk3_ref, bk3_ref, wv3_ref, bv3_ref,
                         wo3_ref, bo_ref, w1_ref, b1_ref, w2_ref, b2_ref,
                         n1w_ref, n1b_ref, n2w_ref, n2b_ref, out_ref):
    f32 = jnp.float32
    tgt = tgt_ref[...]                           # (Nt, E) seq-first rows; batch = row % B
    mem = mem_ref[...]                           # (Nm, E) seq-first rows; batch = row % B
    Nt = tgt.shape[0]
    H = wq3_ref.shape[0]

    # memory = torch.cat([memory, tgt], dim=0): key/value source rows.
    # Cheap sublane concat of VMEM-resident values (no extra HBM traffic).
    kv_src = jnp.concatenate([mem, tgt], axis=0)              # (Nk, E)
    Nk = kv_src.shape[0]

    # Cross-batch mask replaces all per-batch slicing / row concats: in the
    # seq-first layout the batch of any row (query or key) is (row index % B).
    q_id = lax.broadcasted_iota(jnp.int32, (Nt, Nk), 0)
    k_id = lax.broadcasted_iota(jnp.int32, (Nt, Nk), 1)
    same_batch = (q_id % B) == (k_id % B)

    # Residual + out-projection bias; per-head attention outputs are folded
    # straight through the out-projection (no lane-dim head concatenate).
    x = tgt + bo_ref[...]
    for h in range(H):                                        # static unroll, H small
        q_h = jnp.dot(tgt, wq3_ref[h], preferred_element_type=f32) + bq3_ref[h]     # (Nt, hd)
        k_h = jnp.dot(kv_src, wk3_ref[h], preferred_element_type=f32) + bk3_ref[h]  # (Nk, hd)
        v_h = jnp.dot(kv_src, wv3_ref[h], preferred_element_type=f32) + bv3_ref[h]  # (Nk, hd)
        # q @ k^T without materialising a transpose (contract on hd).
        s = lax.dot_general(q_h, k_h, (((1,), (1,)), ((), ())),
                            preferred_element_type=f32)                              # (Nt, Nk)
        s = jnp.where(same_batch, s, -1e30)
        s = s - jnp.max(s, axis=-1, keepdims=True)
        p = jnp.exp(s)
        p = p * pl.reciprocal(jnp.sum(p, axis=-1, keepdims=True), approx=True)
        o_h = jnp.dot(p, v_h, preferred_element_type=f32)                            # (Nt, hd)
        x = x + jnp.dot(o_h, wo3_ref[h], preferred_element_type=f32)                 # (Nt, E)

    # ---- add & norm 1 (dropout1 = identity in eval) -------------------------
    x = _layer_norm(x, n1w_ref[...], n1b_ref[...])

    # ---- FFN: linear2(relu(linear1(x))) + add & norm 2 ----------------------
    h1 = jnp.maximum(
        jnp.dot(x, w1_ref[...], preferred_element_type=f32) + b1_ref[...], 0.0)
    ff = jnp.dot(h1, w2_ref[...], preferred_element_type=f32) + b2_ref[...]
    out_ref[...] = _layer_norm(x + ff, n2w_ref[...], n2b_ref[...])


# ---------------------------------------------------------------------------
# Host-side weight preparation (call ONCE, outside the per-forward jitted path)
# ---------------------------------------------------------------------------
_PARAM_ORDER = ("wq3", "bq3", "wk3", "bk3", "wv3", "bv3", "wo3", "bo",
                "w1_t", "b1", "w2_t", "b2", "n1_w", "n1_b", "n2_w", "n2_b")


def prepare_params(p, nhead):
    """Pre-transpose / head-split / scale-fold PyTorch-layout weights."""
    E = p["norm1_weight"].shape[0]
    hd = E // nhead
    scale = 1.0 / math.sqrt(hd)
    w_in, b_in = p["in_proj_weight"], p["in_proj_bias"]       # (3E, E), (3E,)
    wq, wk, wv = w_in[:E], w_in[E:2 * E], w_in[2 * E:]
    bq, bk, bv = b_in[:E], b_in[E:2 * E], b_in[2 * E:]

    def head_w(w, s=1.0):
        # torch (E_out, E_in) -> (H, E_in, hd) so the kernel computes x @ w[h].
        return jnp.transpose((w * s).reshape(nhead, hd, E), (0, 2, 1))

    def head_b(b, s=1.0):
        return (b * s).reshape(nhead, 1, hd)

    F = p["linear1_weight"].shape[0]
    return {
        "wq3": head_w(wq, scale), "bq3": head_b(bq, scale),   # 1/sqrt(hd) folded in
        "wk3": head_w(wk),        "bk3": head_b(bk),
        "wv3": head_w(wv),        "bv3": head_b(bv),
        "wo3": p["out_proj_weight"].T.reshape(nhead, hd, E),  # (H, hd, E)
        "bo": p["out_proj_bias"].reshape(1, E),
        "w1_t": p["linear1_weight"].T, "b1": p["linear1_bias"].reshape(1, F),
        "w2_t": p["linear2_weight"].T, "b2": p["linear2_bias"].reshape(1, E),
        "n1_w": p["norm1_weight"].reshape(1, E), "n1_b": p["norm1_bias"].reshape(1, E),
        "n2_w": p["norm2_weight"].reshape(1, E), "n2_b": p["norm2_bias"].reshape(1, E),
    }


def _full_spec(shape):
    nd = len(shape)
    return pl.BlockSpec(shape, lambda i, _nd=nd: (0,) * _nd)


@jax.jit
def decoder_layer_forward(tgt_sbe, memory_sbe, prepared):
    """DecoderLayer.forward. tgt: (S,B,E), memory: (M,B,E) -> (S,B,E) (seq-first)."""
    S, B, E = tgt_sbe.shape
    M = memory_sbe.shape[0]

    # Free views (no concat, no transpose): row r of each slab is
    # (seq = r // B, batch = r % B) in seq-first order.
    tgt2d = tgt_sbe.reshape(S * B, E)
    mem2d = memory_sbe.reshape(M * B, E)

    weights = [prepared[k] for k in _PARAM_ORDER]
    in_specs = [_full_spec(tgt2d.shape), _full_spec(mem2d.shape)]
    in_specs += [_full_spec(tuple(w.shape)) for w in weights]

    out2d = pl.pallas_call(
        functools.partial(decoder_layer_kernel, B),
        out_shape=jax.ShapeDtypeStruct((S * B, E), jnp.float32),
        grid=(1,),
        in_specs=in_specs,
        out_specs=_full_spec((S * B, E)),
        compiler_params=pltpu.CompilerParams(
            dimension_semantics=("arbitrary",),
            vmem_limit_bytes=32 * 1024 * 1024),
    )(tgt2d, mem2d, *weights)

    return out2d.reshape(S, B, E)     # free view back to seq-first (S, B, E)


# ---------------------------------------------------------------------------
# Pure-JAX reference (PyTorch eval semantics) for a correctness sanity check
# ---------------------------------------------------------------------------
def decoder_layer_reference(tgt_sbe, memory_sbe, p, nhead):
    S, B, E = tgt_sbe.shape
    hi = jax.lax.Precision.HIGHEST
    mem = jnp.concatenate([memory_sbe, tgt_sbe], axis=0)
    Mc = mem.shape[0]
    hd = E // nhead
    w_in, b_in = p["in_proj_weight"], p["in_proj_bias"]
    q = jnp.einsum("sbe,fe->sbf", tgt_sbe, w_in[:E], precision=hi) + b_in[:E]
    k = jnp.einsum("mbe,fe->mbf", mem, w_in[E:2 * E], precision=hi) + b_in[E:2 * E]
    v = jnp.einsum("mbe,fe->mbf", mem, w_in[2 * E:], precision=hi) + b_in[2 * E:]
    q = q.reshape(S, B, nhead, hd) / math.sqrt(hd)
    k = k.reshape(Mc, B, nhead, hd)
    v = v.reshape(Mc, B, nhead, hd)
    s = jnp.einsum("sbhd,mbhd->bhsm", q, k, precision=hi)
    a = jax.nn.softmax(s, axis=-1)
    o = jnp.einsum("bhsm,mbhd->sbhd", a, v, precision=hi).reshape(S, B, E)
    o = jnp.einsum("sbe,fe->sbf", o, p["out_proj_weight"], precision=hi) + p["out_proj_bias"]

    def ln(x, w, b):
        mu = x.mean(-1, keepdims=True)
        var = ((x - mu) ** 2).mean(-1, keepdims=True)
        return (x - mu) / jnp.sqrt(var + 1e-5) * w + b

    x = ln(tgt_sbe + o, p["norm1_weight"], p["norm1_bias"])
    h = jax.nn.relu(jnp.einsum("sbe,fe->sbf", x, p["linear1_weight"], precision=hi)
                    + p["linear1_bias"])
    f = jnp.einsum("sbf,ef->sbe", h, p["linear2_weight"], precision=hi) + p["linear2_bias"]
    return ln(x + f, p["norm2_weight"], p["norm2_bias"])


def init_torch_style_params(key, d_model, nhead, dim_ff):
    ks = jax.random.split(key, 8)
    f32 = jnp.float32
    E, F = d_model, dim_ff

    def xavier(k, shape, fan_in, fan_out):
        bound = math.sqrt(6.0 / (fan_in + fan_out))
        return jax.random.uniform(k, shape, f32, -bound, bound)

    return {
        # nn.MultiheadAttention layout: in_proj (3E, E), out_proj (E, E)
        "in_proj_weight": xavier(ks[0], (3 * E, E), E, 3 * E),
        "in_proj_bias": 0.1 * jax.random.normal(ks[1], (3 * E,), f32),
        "out_proj_weight": xavier(ks[2], (E, E), E, E),
        "out_proj_bias": 0.1 * jax.random.normal(ks[3], (E,), f32),
        # nn.Linear layout: weight (out, in)
        "linear1_weight": xavier(ks[4], (F, E), E, F),
        "linear1_bias": 0.1 * jax.random.normal(ks[5], (F,), f32),
        "linear2_weight": xavier(ks[6], (E, F), F, E),
        "linear2_bias": 0.1 * jax.random.normal(ks[7], (E,), f32),
        # LayerNorm default init (weight=1, bias=0)
        "norm1_weight": jnp.ones((E,), f32), "norm1_bias": jnp.zeros((E,), f32),
        "norm2_weight": jnp.ones((E,), f32), "norm2_bias": jnp.zeros((E,), f32),
    }


if __name__ == "__main__":
    key = jax.random.PRNGKey(0)
    S, M_SEQ, B, E = 8, 8, 2, 32
    NHEAD, DIM_FF = 4, 64

    k_tgt, k_mem, k_par = jax.random.split(key, 3)
    tgt = jax.random.normal(k_tgt, (S, B, E), jnp.float32)        # (seq, batch, embed)
    memory = jax.random.normal(k_mem, (M_SEQ, B, E), jnp.float32)
    params = init_torch_style_params(k_par, E, NHEAD, DIM_FF)

    # Weight prep runs ONCE, outside the jitted forward (cached / reused).
    prepared = jax.tree_util.tree_map(jax.block_until_ready,
                                      prepare_params(params, NHEAD))

    out = decoder_layer_forward(tgt, memory, prepared)
    out = jax.block_until_ready(out)
    assert out.shape == (S, B, E) and out.dtype == jnp.float32

    ref = decoder_layer_reference(tgt, memory, params, NHEAD)
    assert bool(jnp.allclose(out, ref, atol=2e-2, rtol=2e-2)), \
        float(jnp.max(jnp.abs(out - ref)))

    print("KERNEL_OK")
</pallas_src>

<mosaic_0001>
module attributes {stable_mosaic.version = 11 : i64} {
  func.func @decoder_layer_kernel(%arg0: i32, %arg1: memref<16x32xf32, #tpu.memory_space<vmem>>, %arg2: memref<16x32xf32, #tpu.memory_space<vmem>>, %arg3: memref<4x32x8xf32, #tpu.memory_space<vmem>>, %arg4: memref<4x1x8xf32, #tpu.memory_space<vmem>>, %arg5: memref<4x32x8xf32, #tpu.memory_space<vmem>>, %arg6: memref<4x1x8xf32, #tpu.memory_space<vmem>>, %arg7: memref<4x32x8xf32, #tpu.memory_space<vmem>>, %arg8: memref<4x1x8xf32, #tpu.memory_space<vmem>>, %arg9: memref<4x8x32xf32, #tpu.memory_space<vmem>>, %arg10: memref<1x32xf32, #tpu.memory_space<vmem>>, %arg11: memref<32x64xf32, #tpu.memory_space<vmem>>, %arg12: memref<1x64xf32, #tpu.memory_space<vmem>>, %arg13: memref<64x32xf32, #tpu.memory_space<vmem>>, %arg14: memref<1x32xf32, #tpu.memory_space<vmem>>, %arg15: memref<1x32xf32, #tpu.memory_space<vmem>>, %arg16: memref<1x32xf32, #tpu.memory_space<vmem>>, %arg17: memref<1x32xf32, #tpu.memory_space<vmem>>, %arg18: memref<1x32xf32, #tpu.memory_space<vmem>>, %arg19: memref<16x32xf32, #tpu.memory_space<vmem>>) attributes {dimension_semantics = [#tpu.dimension_semantics<arbitrary>], iteration_bounds = array<i64: 1>, scalar_prefetch = 0 : i64, scratch_operands = 0 : i64, tpu.core_type = #tpu.core_type<tc>, window_params = [{pipeline_mode = #tpu.pipeline_mode<synchronous>, transform_indices = @transform_0, window_bounds = array<i64: 16, 32>}, {pipeline_mode = #tpu.pipeline_mode<synchronous>, transform_indices = @transform_1, window_bounds = array<i64: 16, 32>}, {pipeline_mode = #tpu.pipeline_mode<synchronous>, transform_indices = @transform_2, window_bounds = array<i64: 4, 32, 8>}, {pipeline_mode = #tpu.pipeline_mode<synchronous>, transform_indices = @transform_3, window_bounds = array<i64: 4, 1, 8>}, {pipeline_mode = #tpu.pipeline_mode<synchronous>, transform_indices = @transform_4, window_bounds = array<i64: 4, 32, 8>}, {pipeline_mode = #tpu.pipeline_mode<synchronous>, transform_indices = @transform_5, window_bounds = array<i64: 4, 1, 8>}, {pipeline_mode = #tpu.pipeline_mode<synchronous>, transform_indices = @transform_6, window_bounds = array<i64: 4, 32, 8>}, {pipeline_mode = #tpu.pipeline_mode<synchronous>, transform_indices = @transform_7, window_bounds = array<i64: 4, 1, 8>}, {pipeline_mode = #tpu.pipeline_mode<synchronous>, transform_indices = @transform_8, window_bounds = array<i64: 4, 8, 32>}, {pipeline_mode = #tpu.pipeline_mode<synchronous>, transform_indices = @transform_9, window_bounds = array<i64: 1, 32>}, {pipeline_mode = #tpu.pipeline_mode<synchronous>, transform_indices = @transform_10, window_bounds = array<i64: 32, 64>}, {pipeline_mode = #tpu.pipeline_mode<synchronous>, transform_indices = @transform_11, window_bounds = array<i64: 1, 64>}, {pipeline_mode = #tpu.pipeline_mode<synchronous>, transform_indices = @transform_12, window_bounds = array<i64: 64, 32>}, {pipeline_mode = #tpu.pipeline_mode<synchronous>, transform_indices = @transform_13, window_bounds = array<i64: 1, 32>}, {pipeline_mode = #tpu.pipeline_mode<synchronous>, transform_indices = @transform_14, window_bounds = array<i64: 1, 32>}, {pipeline_mode = #tpu.pipeline_mode<synchronous>, transform_indices = @transform_15, window_bounds = array<i64: 1, 32>}, {pipeline_mode = #tpu.pipeline_mode<synchronous>, transform_indices = @transform_16, window_bounds = array<i64: 1, 32>}, {pipeline_mode = #tpu.pipeline_mode<synchronous>, transform_indices = @transform_17, window_bounds = array<i64: 1, 32>}, {pipeline_mode = #tpu.pipeline_mode<synchronous>, transform_indices = @transform_18, window_bounds = array<i64: 16, 32>}]} {
    %c0 = arith.constant 0 : index
    %c0_0 = arith.constant 0 : index
    %0 = vector.load %arg1[%c0, %c0_0] : memref<16x32xf32, #tpu.memory_space<vmem>>, vector<16x32xf32>
    %c0_1 = arith.constant 0 : index
    %c0_2 = arith.constant 0 : index
    %1 = vector.load %arg2[%c0_1, %c0_2] : memref<16x32xf32, #tpu.memory_space<vmem>>, vector<16x32xf32>
    %2 = tpu.concatenate %1, %0 in 0 : vector<16x32xf32>, vector<16x32xf32> -> vector<32x32xf32>
    %3 = tpu.iota {dimensions = array<i32: 0>} : vector<16x32xi32>
    %4 = tpu.iota {dimensions = array<i32: 1>} : vector<16x32xi32>
    %c2_i32 = arith.constant 2 : i32
    %c0_i32 = arith.constant 0 : i32
    %5 = arith.cmpi eq, %c2_i32, %c0_i32 : i32
    %c1_i32 = arith.constant 1 : i32
    %6 = arith.select %5, %c1_i32, %c2_i32 : i32
    %7 = vector.broadcast %6 : i32 to vector<16x32xi32>
    %8 = arith.remsi %3, %7 : vector<16x32xi32>
    %c0_i32_3 = arith.constant 0 : i32
    %9 = vector.broadcast %c0_i32_3 : i32 to vector<16x32xi32>
    %10 = arith.cmpi ne, %8, %9 : vector<16x32xi32>
    %c0_i32_4 = arith.constant 0 : i32
    %11 = vector.broadcast %c0_i32_4 : i32 to vector<16x32xi32>
    %12 = arith.cmpi slt, %8, %11 : vector<16x32xi32>
    %c0_i32_5 = arith.constant 0 : i32
    %13 = arith.cmpi slt, %6, %c0_i32_5 : i32
    %14 = vector.broadcast %13 : i1 to vector<16x32xi1>
    %15 = vector.broadcast %14 : vector<16x32xi1> to vector<16x32xi1>
    %16 = arith.xori %12, %15 : vector<16x32xi1>
    %17 = arith.andi %16, %10 : vector<16x32xi1>
    %18 = vector.broadcast %6 : i32 to vector<16x32xi32>
    %19 = arith.addi %8, %18 : vector<16x32xi32>
    %20 = arith.select %17, %19, %8 : vector<16x32xi1>, vector<16x32xi32>
    %c2_i32_6 = arith.constant 2 : i32
    %c0_i32_7 = arith.constant 0 : i32
    %21 = arith.cmpi eq, %c2_i32_6, %c0_i32_7 : i32
    %c1_i32_8 = arith.constant 1 : i32
    %22 = arith.select %21, %c1_i32_8, %c2_i32_6 : i32
    %23 = vector.broadcast %22 : i32 to vector<16x32xi32>
    %24 = arith.remsi %4, %23 : vector<16x32xi32>
    %c0_i32_9 = arith.constant 0 : i32
    %25 = vector.broadcast %c0_i32_9 : i32 to vector<16x32xi32>
    %26 = arith.cmpi ne, %24, %25 : vector<16x32xi32>
    %c0_i32_10 = arith.constant 0 : i32
    %27 = vector.broadcast %c0_i32_10 : i32 to vector<16x32xi32>
    %28 = arith.cmpi slt, %24, %27 : vector<16x32xi32>
    %c0_i32_11 = arith.constant 0 : i32
    %29 = arith.cmpi slt, %22, %c0_i32_11 : i32
    %30 = vector.broadcast %29 : i1 to vector<16x32xi1>
    %31 = vector.broadcast %30 : vector<16x32xi1> to vector<16x32xi1>
    %32 = arith.xori %28, %31 : vector<16x32xi1>
    %33 = arith.andi %32, %26 : vector<16x32xi1>
    %34 = vector.broadcast %22 : i32 to vector<16x32xi32>
    %35 = arith.addi %24, %34 : vector<16x32xi32>
    %36 = arith.select %33, %35, %24 : vector<16x32xi1>, vector<16x32xi32>
    %37 = arith.cmpi eq, %20, %36 : vector<16x32xi32>
    %c0_12 = arith.constant 0 : index
    %c0_13 = arith.constant 0 : index
    %38 = vector.load %arg10[%c0_12, %c0_13] : memref<1x32xf32, #tpu.memory_space<vmem>>, vector<1x32xf32>
    %39 = vector.broadcast %38 : vector<1x32xf32> to vector<16x32xf32>
    %40 = arith.addf %0, %39 : vector<16x32xf32>
    %c0_14 = arith.constant 0 : index
    %c0_15 = arith.constant 0 : index
    %c0_16 = arith.constant 0 : index
    %41 = vector.load %arg3[%c0_14, %c0_15, %c0_16] : memref<4x32x8xf32, #tpu.memory_space<vmem>>, vector<1x32x8xf32>
    %42 = vector.shape_cast %41 : vector<1x32x8xf32> to vector<32x8xf32>
    %cst = arith.constant dense<0.000000e+00> : vector<16x8xf32>
    %43 = tpu.matmul %0, %42, %cst {dimension_numbers = #tpu.dot_dimension_numbers<[1], [0], [0], [1], [0, 0, 1, 1], [], []>} : vector<16x32xf32>, vector<32x8xf32>, vector<16x8xf32> -> vector<16x8xf32>
    %c0_17 = arith.constant 0 : index
    %c0_18 = arith.constant 0 : index
    %c0_19 = arith.constant 0 : index
    %44 = vector.load %arg4[%c0_17, %c0_18, %c0_19] : memref<4x1x8xf32, #tpu.memory_space<vmem>>, vector<1x1x8xf32>
    %45 = vector.shape_cast %44 : vector<1x1x8xf32> to vector<1x8xf32>
    %46 = vector.broadcast %45 : vector<1x8xf32> to vector<16x8xf32>
    %47 = arith.addf %43, %46 : vector<16x8xf32>
    %c0_20 = arith.constant 0 : index
    %c0_21 = arith.constant 0 : index
    %c0_22 = arith.constant 0 : index
    %48 = vector.load %arg5[%c0_20, %c0_21, %c0_22] : memref<4x32x8xf32, #tpu.memory_space<vmem>>, vector<1x32x8xf32>
    %49 = vector.shape_cast %48 : vector<1x32x8xf32> to vector<32x8xf32>
    %cst_23 = arith.constant dense<0.000000e+00> : vector<32x8xf32>
    %50 = tpu.matmul %2, %49, %cst_23 {dimension_numbers = #tpu.dot_dimension_numbers<[1], [0], [0], [1], [0, 0, 1, 1], [], []>} : vector<32x32xf32>, vector<32x8xf32>, vector<32x8xf32> -> vector<32x8xf32>
    %c0_24 = arith.constant 0 : index
    %c0_25 = arith.constant 0 : index
    %c0_26 = arith.constant 0 : index
    %51 = vector.load %arg6[%c0_24, %c0_25, %c0_26] : memref<4x1x8xf32, #tpu.memory_space<vmem>>, vector<1x1x8xf32>
    %52 = vector.shape_cast %51 : vector<1x1x8xf32> to vector<1x8xf32>
    %53 = vector.broadcast %52 : vector<1x8xf32> to vector<32x8xf32>
    %54 = arith.addf %50, %53 : vector<32x8xf32>
    %c0_27 = arith.constant 0 : index
    %c0_28 = arith.constant 0 : index
    %c0_29 = arith.constant 0 : index
    %55 = vector.load %arg7[%c0_27, %c0_28, %c0_29] : memref<4x32x8xf32, #tpu.memory_space<vmem>>, vector<1x32x8xf32>
    %56 = vector.shape_cast %55 : vector<1x32x8xf32> to vector<32x8xf32>
    %cst_30 = arith.constant dense<0.000000e+00> : vector<32x8xf32>
    %57 = tpu.matmul %2, %56, %cst_30 {dimension_numbers = #tpu.dot_dimension_numbers<[1], [0], [0], [1], [0, 0, 1, 1], [], []>} : vector<32x32xf32>, vector<32x8xf32>, vector<32x8xf32> -> vector<32x8xf32>
    %c0_31 = arith.constant 0 : index
    %c0_32 = arith.constant 0 : index
    %c0_33 = arith.constant 0 : index
    %58 = vector.load %arg8[%c0_31, %c0_32, %c0_33] : memref<4x1x8xf32, #tpu.memory_space<vmem>>, vector<1x1x8xf32>
    %59 = vector.shape_cast %58 : vector<1x1x8xf32> to vector<1x8xf32>
    %60 = vector.broadcast %59 : vector<1x8xf32> to vector<32x8xf32>
    %61 = arith.addf %57, %60 : vector<32x8xf32>
    %cst_34 = arith.constant dense<0.000000e+00> : vector<16x32xf32>
    %62 = tpu.matmul %47, %54, %cst_34 {dimension_numbers = #tpu.dot_dimension_numbers<[1], [1], [0], [0], [0, 0, 1, 0], [], []>} : vector<16x8xf32>, vector<32x8xf32>, vector<16x32xf32> -> vector<16x32xf32>
    %cst_35 = arith.constant -1.000000e+30 : f32
    %63 = vector.broadcast %cst_35 : f32 to vector<16x32xf32>
    %64 = arith.select %37, %62, %63 : vector<16x32xi1>, vector<16x32xf32>
    %cst_36 = arith.constant dense<0xFF800000> : vector<16xf32>
    %65 = vector.multi_reduction <maximumf>, %64, %cst_36 [1] : vector<16x32xf32> to vector<16xf32>
    %66 = vector.shape_cast %65 : vector<16xf32> to vector<16x1xf32>
    %67 = vector.broadcast %66 : vector<16x1xf32> to vector<16x32xf32>
    %68 = arith.subf %64, %67 : vector<16x32xf32>
    %69 = math.exp %68 : vector<16x32xf32>
    %cst_37 = arith.constant dense<0.000000e+00> : vector<16xf32>
    %70 = vector.multi_reduction <add>, %69, %cst_37 [1] : vector<16x32xf32> to vector<16xf32>
    %71 = vector.shape_cast %70 : vector<16xf32> to vector<16x1xf32>
    %72 = tpu.reciprocal %71 {approx = true} : vector<16x1xf32> -> vector<16x1xf32>
    %73 = vector.broadcast %72 : vector<16x1xf32> to vector<16x32xf32>
    %74 = arith.mulf %69, %73 : vector<16x32xf32>
    %cst_38 = arith.constant dense<0.000000e+00> : vector<16x8xf32>
    %75 = tpu.matmul %74, %61, %cst_38 {dimension_numbers = #tpu.dot_dimension_numbers<[1], [0], [0], [1], [0, 0, 1, 1], [], []>} : vector<16x32xf32>, vector<32x8xf32>, vector<16x8xf32> -> vector<16x8xf32>
    %c0_39 = arith.constant 0 : index
    %c0_40 = arith.constant 0 : index
    %c0_41 = arith.constant 0 : index
    %76 = vector.load %arg9[%c0_39, %c0_40, %c0_41] : memref<4x8x32xf32, #tpu.memory_space<vmem>>, vector<1x8x32xf32>
    %77 = vector.shape_cast %76 : vector<1x8x32xf32> to vector<8x32xf32>
    %cst_42 = arith.constant dense<0.000000e+00> : vector<16x32xf32>
    %78 = tpu.matmul %75, %77, %cst_42 {dimension_numbers = #tpu.dot_dimension_numbers<[1], [0], [0], [1], [0, 0, 1, 1], [], []>} : vector<16x8xf32>, vector<8x32xf32>, vector<16x32xf32> -> vector<16x32xf32>
    %79 = arith.addf %40, %78 : vector<16x32xf32>
    %c1 = arith.constant 1 : index
    %c0_43 = arith.constant 0 : index
    %c0_44 = arith.constant 0 : index
    %80 = vector.load %arg3[%c1, %c0_43, %c0_44] : memref<4x32x8xf32, #tpu.memory_space<vmem>>, vector<1x32x8xf32>
    %81 = vector.shape_cast %80 : vector<1x32x8xf32> to vector<32x8xf32>
    %cst_45 = arith.constant dense<0.000000e+00> : vector<16x8xf32>
    %82 = tpu.matmul %0, %81, %cst_45 {dimension_numbers = #tpu.dot_dimension_numbers<[1], [0], [0], [1], [0, 0, 1, 1], [], []>} : vector<16x32xf32>, vector<32x8xf32>, vector<16x8xf32> -> vector<16x8xf32>
    %c1_46 = arith.constant 1 : index
    %c0_47 = arith.constant 0 : index
    %c0_48 = arith.constant 0 : index
    %83 = vector.load %arg4[%c1_46, %c0_47, %c0_48] : memref<4x1x8xf32, #tpu.memory_space<vmem>>, vector<1x1x8xf32>
    %84 = vector.shape_cast %83 : vector<1x1x8xf32> to vector<1x8xf32>
    %85 = vector.broadcast %84 : vector<1x8xf32> to vector<16x8xf32>
    %86 = arith.addf %82, %85 : vector<16x8xf32>
    %c1_49 = arith.constant 1 : index
    %c0_50 = arith.constant 0 : index
    %c0_51 = arith.constant 0 : index
    %87 = vector.load %arg5[%c1_49, %c0_50, %c0_51] : memref<4x32x8xf32, #tpu.memory_space<vmem>>, vector<1x32x8xf32>
    %88 = vector.shape_cast %87 : vector<1x32x8xf32> to vector<32x8xf32>
    %cst_52 = arith.constant dense<0.000000e+00> : vector<32x8xf32>
    %89 = tpu.matmul %2, %88, %cst_52 {dimension_numbers = #tpu.dot_dimension_numbers<[1], [0], [0], [1], [0, 0, 1, 1], [], []>} : vector<32x32xf32>, vector<32x8xf32>, vector<32x8xf32> -> vector<32x8xf32>
    %c1_53 = arith.constant 1 : index
    %c0_54 = arith.constant 0 : index
    %c0_55 = arith.constant 0 : index
    %90 = vector.load %arg6[%c1_53, %c0_54, %c0_55] : memref<4x1x8xf32, #tpu.memory_space<vmem>>, vector<1x1x8xf32>
    %91 = vector.shape_cast %90 : vector<1x1x8xf32> to vector<1x8xf32>
    %92 = vector.broadcast %91 : vector<1x8xf32> to vector<32x8xf32>
    %93 = arith.addf %89, %92 : vector<32x8xf32>
    %c1_56 = arith.constant 1 : index
    %c0_57 = arith.constant 0 : index
    %c0_58 = arith.constant 0 : index
    %94 = vector.load %arg7[%c1_56, %c0_57, %c0_58] : memref<4x32x8xf32, #tpu.memory_space<vmem>>, vector<1x32x8xf32>
    %95 = vector.shape_cast %94 : vector<1x32x8xf32> to vector<32x8xf32>
    %cst_59 = arith.constant dense<0.000000e+00> : vector<32x8xf32>
    %96 = tpu.matmul %2, %95, %cst_59 {dimension_numbers = #tpu.dot_dimension_numbers<[1], [0], [0], [1], [0, 0, 1, 1], [], []>} : vector<32x32xf32>, vector<32x8xf32>, vector<32x8xf32> -> vector<32x8xf32>
    %c1_60 = arith.constant 1 : index
    %c0_61 = arith.constant 0 : index
    %c0_62 = arith.constant 0 : index
    %97 = vector.load %arg8[%c1_60, %c0_61, %c0_62] : memref<4x1x8xf32, #tpu.memory_space<vmem>>, vector<1x1x8xf32>
    %98 = vector.shape_cast %97 : vector<1x1x8xf32> to vector<1x8xf32>
    %99 = vector.broadcast %98 : vector<1x8xf32> to vector<32x8xf32>
    %100 = arith.addf %96, %99 : vector<32x8xf32>
    %cst_63 = arith.constant dense<0.000000e+00> : vector<16x32xf32>
    %101 = tpu.matmul %86, %93, %cst_63 {dimension_numbers = #tpu.dot_dimension_numbers<[1], [1], [0], [0], [0, 0, 1, 0], [], []>} : vector<16x8xf32>, vector<32x8xf32>, vector<16x32xf32> -> vector<16x32xf32>
    %cst_64 = arith.constant -1.000000e+30 : f32
    %102 = vector.broadcast %cst_64 : f32 to vector<16x32xf32>
    %103 = arith.select %37, %101, %102 : vector<16x32xi1>, vector<16x32xf32>
    %cst_65 = arith.constant dense<0xFF800000> : vector<16xf32>
    %104 = vector.multi_reduction <maximumf>, %103, %cst_65 [1] : vector<16x32xf32> to vector<16xf32>
    %105 = vector.shape_cast %104 : vector<16xf32> to vector<16x1xf32>
    %106 = vector.broadcast %105 : vector<16x1xf32> to vector<16x32xf32>
    %107 = arith.subf %103, %106 : vector<16x32xf32>
    %108 = math.exp %107 : vector<16x32xf32>
    %cst_66 = arith.constant dense<0.000000e+00> : vector<16xf32>
    %109 = vector.multi_reduction <add>, %108, %cst_66 [1] : vector<16x32xf32> to vector<16xf32>
    %110 = vector.shape_cast %109 : vector<16xf32> to vector<16x1xf32>
    %111 = tpu.reciprocal %110 {approx = true} : vector<16x1xf32> -> vector<16x1xf32>
    %112 = vector.broadcast %111 : vector<16x1xf32> to vector<16x32xf32>
    %113 = arith.mulf %108, %112 : vector<16x32xf32>
    %cst_67 = arith.constant dense<0.000000e+00> : vector<16x8xf32>
    %114 = tpu.matmul %113, %100, %cst_67 {dimension_numbers = #tpu.dot_dimension_numbers<[1], [0], [0], [1], [0, 0, 1, 1], [], []>} : vector<16x32xf32>, vector<32x8xf32>, vector<16x8xf32> -> vector<16x8xf32>
    %c1_68 = arith.constant 1 : index
    %c0_69 = arith.constant 0 : index
    %c0_70 = arith.constant 0 : index
    %115 = vector.load %arg9[%c1_68, %c0_69, %c0_70] : memref<4x8x32xf32, #tpu.memory_space<vmem>>, vector<1x8x32xf32>
    %116 = vector.shape_cast %115 : vector<1x8x32xf32> to vector<8x32xf32>
    %cst_71 = arith.constant dense<0.000000e+00> : vector<16x32xf32>
    %117 = tpu.matmul %114, %116, %cst_71 {dimension_numbers = #tpu.dot_dimension_numbers<[1], [0], [0], [1], [0, 0, 1, 1], [], []>} : vector<16x8xf32>, vector<8x32xf32>, vector<16x32xf32> -> vector<16x32xf32>
    %118 = arith.addf %79, %117 : vector<16x32xf32>
    %c2 = arith.constant 2 : index
    %c0_72 = arith.constant 0 : index
    %c0_73 = arith.constant 0 : index
    %119 = vector.load %arg3[%c2, %c0_72, %c0_73] : memref<4x32x8xf32, #tpu.memory_space<vmem>>, vector<1x32x8xf32>
    %120 = vector.shape_cast %119 : vector<1x32x8xf32> to vector<32x8xf32>
    %cst_74 = arith.constant dense<0.000000e+00> : vector<16x8xf32>
    %121 = tpu.matmul %0, %120, %cst_74 {dimension_numbers = #tpu.dot_dimension_numbers<[1], [0], [0], [1], [0, 0, 1, 1], [], []>} : vector<16x32xf32>, vector<32x8xf32>, vector<16x8xf32> -> vector<16x8xf32>
    %c2_75 = arith.constant 2 : index
    %c0_76 = arith.constant 0 : index
    %c0_77 = arith.constant 0 : index
    %122 = vector.load %arg4[%c2_75, %c0_76, %c0_77] : memref<4x1x8xf32, #tpu.memory_space<vmem>>, vector<1x1x8xf32>
    %123 = vector.shape_cast %122 : vector<1x1x8xf32> to vector<1x8xf32>
    %124 = vector.broadcast %123 : vector<1x8xf32> to vector<16x8xf32>
    %125 = arith.addf %121, %124 : vector<16x8xf32>
    %c2_78 = arith.constant 2 : index
    %c0_79 = arith.constant 0 : index
    %c0_80 = arith.constant 0 : index
    %126 = vector.load %arg5[%c2_78, %c0_79, %c0_80] : memref<4x32x8xf32, #tpu.memory_space<vmem>>, vector<1x32x8xf32>
    %127 = vector.shape_cast %126 : vector<1x32x8xf32> to vector<32x8xf32>
    %cst_81 = arith.constant dense<0.000000e+00> : vector<32x8xf32>
    %128 = tpu.matmul %2, %127, %cst_81 {dimension_numbers = #tpu.dot_dimension_numbers<[1], [0], [0], [1], [0, 0, 1, 1], [], []>} : vector<32x32xf32>, vector<32x8xf32>, vector<32x8xf32> -> vector<32x8xf32>
    %c2_82 = arith.constant 2 : index
    %c0_83 = arith.constant 0 : index
    %c0_84 = arith.constant 0 : index
    %129 = vector.load %arg6[%c2_82, %c0_83, %c0_84] : memref<4x1x8xf32, #tpu.memory_space<vmem>>, vector<1x1x8xf32>
    %130 = vector.shape_cast %129 : vector<1x1x8xf32> to vector<1x8xf32>
    %131 = vector.broadcast %130 : vector<1x8xf32> to vector<32x8xf32>
    %132 = arith.addf %128, %131 : vector<32x8xf32>
    %c2_85 = arith.constant 2 : index
    %c0_86 = arith.constant 0 : index
    %c0_87 = arith.constant 0 : index
    %133 = vector.load %arg7[%c2_85, %c0_86, %c0_87] : memref<4x32x8xf32, #tpu.memory_space<vmem>>, vector<1x32x8xf32>
    %134 = vector.shape_cast %133 : vector<1x32x8xf32> to vector<32x8xf32>
    %cst_88 = arith.constant dense<0.000000e+00> : vector<32x8xf32>
    %135 = tpu.matmul %2, %134, %cst_88 {dimension_numbers = #tpu.dot_dimension_numbers<[1], [0], [0], [1], [0, 0, 1, 1], [], []>} : vector<32x32xf32>, vector<32x8xf32>, vector<32x8xf32> -> vector<32x8xf32>
    %c2_89 = arith.constant 2 : index
    %c0_90 = arith.constant 0 : index
    %c0_91 = arith.constant 0 : index
    %136 = vector.load %arg8[%c2_89, %c0_90, %c0_91] : memref<4x1x8xf32, #tpu.memory_space<vmem>>, vector<1x1x8xf32>
    %137 = vector.shape_cast %136 : vector<1x1x8xf32> to vector<1x8xf32>
    %138 = vector.broadcast %137 : vector<1x8xf32> to vector<32x8xf32>
    %139 = arith.addf %135, %138 : vector<32x8xf32>
    %cst_92 = arith.constant dense<0.000000e+00> : vector<16x32xf32>
    %140 = tpu.matmul %125, %132, %cst_92 {dimension_numbers = #tpu.dot_dimension_numbers<[1], [1], [0], [0], [0, 0, 1, 0], [], []>} : vector<16x8xf32>, vector<32x8xf32>, vector<16x32xf32> -> vector<16x32xf32>
    %cst_93 = arith.constant -1.000000e+30 : f32
    %141 = vector.broadcast %cst_93 : f32 to vector<16x32xf32>
    %142 = arith.select %37, %140, %141 : vector<16x32xi1>, vector<16x32xf32>
    %cst_94 = arith.constant dense<0xFF800000> : vector<16xf32>
    %143 = vector.multi_reduction <maximumf>, %142, %cst_94 [1] : vector<16x32xf32> to vector<16xf32>
    %144 = vector.shape_cast %143 : vector<16xf32> to vector<16x1xf32>
    %145 = vector.broadcast %144 : vector<16x1xf32> to vector<16x32xf32>
    %146 = arith.subf %142, %145 : vector<16x32xf32>
    %147 = math.exp %146 : vector<16x32xf32>
    %cst_95 = arith.constant dense<0.000000e+00> : vector<16xf32>
    %148 = vector.multi_reduction <add>, %147, %cst_95 [1] : vector<16x32xf32> to vector<16xf32>
    %149 = vector.shape_cast %148 : vector<16xf32> to vector<16x1xf32>
    %150 = tpu.reciprocal %149 {approx = true} : vector<16x1xf32> -> vector<16x1xf32>
    %151 = vector.broadcast %150 : vector<16x1xf32> to vector<16x32xf32>
    %152 = arith.mulf %147, %151 : vector<16x32xf32>
    %cst_96 = arith.constant dense<0.000000e+00> : vector<16x8xf32>
    %153 = tpu.matmul %152, %139, %cst_96 {dimension_numbers = #tpu.dot_dimension_numbers<[1], [0], [0], [1], [0, 0, 1, 1], [], []>} : vector<16x32xf32>, vector<32x8xf32>, vector<16x8xf32> -> vector<16x8xf32>
    %c2_97 = arith.constant 2 : index
    %c0_98 = arith.constant 0 : index
    %c0_99 = arith.constant 0 : index
    %154 = vector.load %arg9[%c2_97, %c0_98, %c0_99] : memref<4x8x32xf32, #tpu.memory_space<vmem>>, vector<1x8x32xf32>
    %155 = vector.shape_cast %154 : vector<1x8x32xf32> to vector<8x32xf32>
    %cst_100 = arith.constant dense<0.000000e+00> : vector<16x32xf32>
    %156 = tpu.matmul %153, %155, %cst_100 {dimension_numbers = #tpu.dot_dimension_numbers<[1], [0], [0], [1], [0, 0, 1, 1], [], []>} : vector<16x8xf32>, vector<8x32xf32>, vector<16x32xf32> -> vector<16x32xf32>
    %157 = arith.addf %118, %156 : vector<16x32xf32>
    %c3 = arith.constant 3 : index
    %c0_101 = arith.constant 0 : index
    %c0_102 = arith.constant 0 : index
    %158 = vector.load %arg3[%c3, %c0_101, %c0_102] : memref<4x32x8xf32, #tpu.memory_space<vmem>>, vector<1x32x8xf32>
    %159 = vector.shape_cast %158 : vector<1x32x8xf32> to vector<32x8xf32>
    %cst_103 = arith.constant dense<0.000000e+00> : vector<16x8xf32>
    %160 = tpu.matmul %0, %159, %cst_103 {dimension_numbers = #tpu.dot_dimension_numbers<[1], [0], [0], [1], [0, 0, 1, 1], [], []>} : vector<16x32xf32>, vector<32x8xf32>, vector<16x8xf32> -> vector<16x8xf32>
    %c3_104 = arith.constant 3 : index
    %c0_105 = arith.constant 0 : index
    %c0_106 = arith.constant 0 : index
    %161 = vector.load %arg4[%c3_104, %c0_105, %c0_106] : memref<4x1x8xf32, #tpu.memory_space<vmem>>, vector<1x1x8xf32>
    %162 = vector.shape_cast %161 : vector<1x1x8xf32> to vector<1x8xf32>
    %163 = vector.broadcast %162 : vector<1x8xf32> to vector<16x8xf32>
    %164 = arith.addf %160, %163 : vector<16x8xf32>
    %c3_107 = arith.constant 3 : index
    %c0_108 = arith.constant 0 : index
    %c0_109 = arith.constant 0 : index
    %165 = vector.load %arg5[%c3_107, %c0_108, %c0_109] : memref<4x32x8xf32, #tpu.memory_space<vmem>>, vector<1x32x8xf32>
    %166 = vector.shape_cast %165 : vector<1x32x8xf32> to vector<32x8xf32>
    %cst_110 = arith.constant dense<0.000000e+00> : vector<32x8xf32>
    %167 = tpu.matmul %2, %166, %cst_110 {dimension_numbers = #tpu.dot_dimension_numbers<[1], [0], [0], [1], [0, 0, 1, 1], [], []>} : vector<32x32xf32>, vector<32x8xf32>, vector<32x8xf32> -> vector<32x8xf32>
    %c3_111 = arith.constant 3 : index
    %c0_112 = arith.constant 0 : index
    %c0_113 = arith.constant 0 : index
    %168 = vector.load %arg6[%c3_111, %c0_112, %c0_113] : memref<4x1x8xf32, #tpu.memory_space<vmem>>, vector<1x1x8xf32>
    %169 = vector.shape_cast %168 : vector<1x1x8xf32> to vector<1x8xf32>
    %170 = vector.broadcast %169 : vector<1x8xf32> to vector<32x8xf32>
    %171 = arith.addf %167, %170 : vector<32x8xf32>
    %c3_114 = arith.constant 3 : index
    %c0_115 = arith.constant 0 : index
    %c0_116 = arith.constant 0 : index
    %172 = vector.load %arg7[%c3_114, %c0_115, %c0_116] : memref<4x32x8xf32, #tpu.memory_space<vmem>>, vector<1x32x8xf32>
    %173 = vector.shape_cast %172 : vector<1x32x8xf32> to vector<32x8xf32>
    %cst_117 = arith.constant dense<0.000000e+00> : vector<32x8xf32>
    %174 = tpu.matmul %2, %173, %cst_117 {dimension_numbers = #tpu.dot_dimension_numbers<[1], [0], [0], [1], [0, 0, 1, 1], [], []>} : vector<32x32xf32>, vector<32x8xf32>, vector<32x8xf32> -> vector<32x8xf32>
    %c3_118 = arith.constant 3 : index
    %c0_119 = arith.constant 0 : index
    %c0_120 = arith.constant 0 : index
    %175 = vector.load %arg8[%c3_118, %c0_119, %c0_120] : memref<4x1x8xf32, #tpu.memory_space<vmem>>, vector<1x1x8xf32>
    %176 = vector.shape_cast %175 : vector<1x1x8xf32> to vector<1x8xf32>
    %177 = vector.broadcast %176 : vector<1x8xf32> to vector<32x8xf32>
    %178 = arith.addf %174, %177 : vector<32x8xf32>
    %cst_121 = arith.constant dense<0.000000e+00> : vector<16x32xf32>
    %179 = tpu.matmul %164, %171, %cst_121 {dimension_numbers = #tpu.dot_dimension_numbers<[1], [1], [0], [0], [0, 0, 1, 0], [], []>} : vector<16x8xf32>, vector<32x8xf32>, vector<16x32xf32> -> vector<16x32xf32>
    %cst_122 = arith.constant -1.000000e+30 : f32
    %180 = vector.broadcast %cst_122 : f32 to vector<16x32xf32>
    %181 = arith.select %37, %179, %180 : vector<16x32xi1>, vector<16x32xf32>
    %cst_123 = arith.constant dense<0xFF800000> : vector<16xf32>
    %182 = vector.multi_reduction <maximumf>, %181, %cst_123 [1] : vector<16x32xf32> to vector<16xf32>
    %183 = vector.shape_cast %182 : vector<16xf32> to vector<16x1xf32>
    %184 = vector.broadcast %183 : vector<16x1xf32> to vector<16x32xf32>
    %185 = arith.subf %181, %184 : vector<16x32xf32>
    %186 = math.exp %185 : vector<16x32xf32>
    %cst_124 = arith.constant dense<0.000000e+00> : vector<16xf32>
    %187 = vector.multi_reduction <add>, %186, %cst_124 [1] : vector<16x32xf32> to vector<16xf32>
    %188 = vector.shape_cast %187 : vector<16xf32> to vector<16x1xf32>
    %189 = tpu.reciprocal %188 {approx = true} : vector<16x1xf32> -> vector<16x1xf32>
    %190 = vector.broadcast %189 : vector<16x1xf32> to vector<16x32xf32>
    %191 = arith.mulf %186, %190 : vector<16x32xf32>
    %cst_125 = arith.constant dense<0.000000e+00> : vector<16x8xf32>
    %192 = tpu.matmul %191, %178, %cst_125 {dimension_numbers = #tpu.dot_dimension_numbers<[1], [0], [0], [1], [0, 0, 1, 1], [], []>} : vector<16x32xf32>, vector<32x8xf32>, vector<16x8xf32> -> vector<16x8xf32>
    %c3_126 = arith.constant 3 : index
    %c0_127 = arith.constant 0 : index
    %c0_128 = arith.constant 0 : index
    %193 = vector.load %arg9[%c3_126, %c0_127, %c0_128] : memref<4x8x32xf32, #tpu.memory_space<vmem>>, vector<1x8x32xf32>
    %194 = vector.shape_cast %193 : vector<1x8x32xf32> to vector<8x32xf32>
    %cst_129 = arith.constant dense<0.000000e+00> : vector<16x32xf32>
    %195 = tpu.matmul %192, %194, %cst_129 {dimension_numbers = #tpu.dot_dimension_numbers<[1], [0], [0], [1], [0, 0, 1, 1], [], []>} : vector<16x8xf32>, vector<8x32xf32>, vector<16x32xf32> -> vector<16x32xf32>
    %196 = arith.addf %157, %195 : vector<16x32xf32>
    %c0_130 = arith.constant 0 : index
    %c0_131 = arith.constant 0 : index
    %197 = vector.load %arg15[%c0_130, %c0_131] : memref<1x32xf32, #tpu.memory_space<vmem>>, vector<1x32xf32>
    %c0_132 = arith.constant 0 : index
    %c0_133 = arith.constant 0 : index
    %198 = vector.load %arg16[%c0_132, %c0_133] : memref<1x32xf32, #tpu.memory_space<vmem>>, vector<1x32xf32>
    %cst_134 = arith.constant dense<0.000000e+00> : vector<16xf32>
    %199 = vector.multi_reduction <add>, %196, %cst_134 [1] : vector<16x32xf32> to vector<16xf32>
    %200 = vector.shape_cast %199 : vector<16xf32> to vector<16x1xf32>
    %cst_135 = arith.constant 3.200000e+01 : f32
    %201 = vector.broadcast %cst_135 : f32 to vector<16x1xf32>
    %202 = arith.divf %200, %201 : vector<16x1xf32>
    %203 = vector.broadcast %202 : vector<16x1xf32> to vector<16x32xf32>
    %204 = arith.subf %196, %203 : vector<16x32xf32>
    %205 = arith.mulf %204, %204 : vector<16x32xf32>
    %cst_136 = arith.constant dense<0.000000e+00> : vector<16xf32>
    %206 = vector.multi_reduction <add>, %205, %cst_136 [1] : vector<16x32xf32> to vector<16xf32>
    %207 = vector.shape_cast %206 : vector<16xf32> to vector<16x1xf32>
    %cst_137 = arith.constant 3.200000e+01 : f32
    %208 = vector.broadcast %cst_137 : f32 to vector<16x1xf32>
    %209 = arith.divf %207, %208 : vector<16x1xf32>
    %210 = vector.broadcast %202 : vector<16x1xf32> to vector<16x32xf32>
    %211 = arith.subf %196, %210 : vector<16x32xf32>
    %cst_138 = arith.constant 9.99999974E-6 : f32
    %212 = vector.broadcast %cst_138 : f32 to vector<16x1xf32>
    %213 = arith.addf %209, %212 : vector<16x1xf32>
    %214 = math.rsqrt %213 : vector<16x1xf32>
    %215 = vector.broadcast %214 : vector<16x1xf32> to vector<16x32xf32>
    %216 = arith.mulf %211, %215 : vector<16x32xf32>
    %217 = vector.broadcast %197 : vector<1x32xf32> to vector<16x32xf32>
    %218 = arith.mulf %216, %217 : vector<16x32xf32>
    %219 = vector.broadcast %198 : vector<1x32xf32> to vector<16x32xf32>
    %220 = arith.addf %218, %219 : vector<16x32xf32>
    %c0_139 = arith.constant 0 : index
    %c0_140 = arith.constant 0 : index
    %221 = vector.load %arg11[%c0_139, %c0_140] : memref<32x64xf32, #tpu.memory_space<vmem>>, vector<32x64xf32>
    %cst_141 = arith.constant dense<0.000000e+00> : vector<16x64xf32>
    %222 = tpu.matmul %220, %221, %cst_141 {dimension_numbers = #tpu.dot_dimension_numbers<[1], [0], [0], [1], [0, 0, 1, 1], [], []>} : vector<16x32xf32>, vector<32x64xf32>, vector<16x64xf32> -> vector<16x64xf32>
    %c0_142 = arith.constant 0 : index
    %c0_143 = arith.constant 0 : index
    %223 = vector.load %arg12[%c0_142, %c0_143] : memref<1x64xf32, #tpu.memory_space<vmem>>, vector<1x64xf32>
    %224 = vector.broadcast %223 : vector<1x64xf32> to vector<16x64xf32>
    %225 = arith.addf %222, %224 : vector<16x64xf32>
    %cst_144 = arith.constant 0.000000e+00 : f32
    %226 = vector.broadcast %cst_144 : f32 to vector<16x64xf32>
    %227 = arith.maximumf %225, %226 : vector<16x64xf32>
    %c0_145 = arith.constant 0 : index
    %c0_146 = arith.constant 0 : index
    %228 = vector.load %arg13[%c0_145, %c0_146] : memref<64x32xf32, #tpu.memory_space<vmem>>, vector<64x32xf32>
    %cst_147 = arith.constant dense<0.000000e+00> : vector<16x32xf32>
    %229 = tpu.matmul %227, %228, %cst_147 {dimension_numbers = #tpu.dot_dimension_numbers<[1], [0], [0], [1], [0, 0, 1, 1], [], []>} : vector<16x64xf32>, vector<64x32xf32>, vector<16x32xf32> -> vector<16x32xf32>
    %c0_148 = arith.constant 0 : index
    %c0_149 = arith.constant 0 : index
    %230 = vector.load %arg14[%c0_148, %c0_149] : memref<1x32xf32, #tpu.memory_space<vmem>>, vector<1x32xf32>
    %231 = vector.broadcast %230 : vector<1x32xf32> to vector<16x32xf32>
    %232 = arith.addf %229, %231 : vector<16x32xf32>
    %233 = arith.addf %220, %232 : vector<16x32xf32>
    %c0_150 = arith.constant 0 : index
    %c0_151 = arith.constant 0 : index
    %234 = vector.load %arg17[%c0_150, %c0_151] : memref<1x32xf32, #tpu.memory_space<vmem>>, vector<1x32xf32>
    %c0_152 = arith.constant 0 : index
    %c0_153 = arith.constant 0 : index
    %235 = vector.load %arg18[%c0_152, %c0_153] : memref<1x32xf32, #tpu.memory_space<vmem>>, vector<1x32xf32>
    %cst_154 = arith.constant dense<0.000000e+00> : vector<16xf32>
    %236 = vector.multi_reduction <add>, %233, %cst_154 [1] : vector<16x32xf32> to vector<16xf32>
    %237 = vector.shape_cast %236 : vector<16xf32> to vector<16x1xf32>
    %cst_155 = arith.constant 3.200000e+01 : f32
    %238 = vector.broadcast %cst_155 : f32 to vector<16x1xf32>
    %239 = arith.divf %237, %238 : vector<16x1xf32>
    %240 = vector.broadcast %239 : vector<16x1xf32> to vector<16x32xf32>
    %241 = arith.subf %233, %240 : vector<16x32xf32>
    %242 = arith.mulf %241, %241 : vector<16x32xf32>
    %cst_156 = arith.constant dense<0.000000e+00> : vector<16xf32>
    %243 = vector.multi_reduction <add>, %242, %cst_156 [1] : vector<16x32xf32> to vector<16xf32>
    %244 = vector.shape_cast %243 : vector<16xf32> to vector<16x1xf32>
    %cst_157 = arith.constant 3.200000e+01 : f32
    %245 = vector.broadcast %cst_157 : f32 to vector<16x1xf32>
    %246 = arith.divf %244, %245 : vector<16x1xf32>
    %247 = vector.broadcast %239 : vector<16x1xf32> to vector<16x32xf32>
    %248 = arith.subf %233, %247 : vector<16x32xf32>
    %cst_158 = arith.constant 9.99999974E-6 : f32
    %249 = vector.broadcast %cst_158 : f32 to vector<16x1xf32>
    %250 = arith.addf %246, %249 : vector<16x1xf32>
    %251 = math.rsqrt %250 : vector<16x1xf32>
    %252 = vector.broadcast %251 : vector<16x1xf32> to vector<16x32xf32>
    %253 = arith.mulf %248, %252 : vector<16x32xf32>
    %254 = vector.broadcast %234 : vector<1x32xf32> to vector<16x32xf32>
    %255 = arith.mulf %253, %254 : vector<16x32xf32>
    %256 = vector.broadcast %235 : vector<1x32xf32> to vector<16x32xf32>
    %257 = arith.addf %255, %256 : vector<16x32xf32>
    %c0_159 = arith.constant 0 : index
    %c0_160 = arith.constant 0 : index
    %258 = vector.load %arg19[%c0_159, %c0_160] : memref<16x32xf32, #tpu.memory_space<vmem>>, vector<16x32xf32>
    tpu.vector_store %arg19[%c0_159, %c0_160], %257 {strides = array<i32>} : memref<16x32xf32, #tpu.memory_space<vmem>>, vector<16x32xf32>,
    return
  }
  func.func @transform_0(%arg0: i32) -> (i32, i32) {
    %c0_i32 = arith.constant 0 : i32
    %c0_i32_0 = arith.constant 0 : i32
    %c0_i32_1 = arith.constant 0 : i32
    return %c0_i32, %c0_i32_0 : i32, i32
  }
  func.func @transform_1(%arg0: i32) -> (i32, i32) {
    %c0_i32 = arith.constant 0 : i32
    %c0_i32_0 = arith.constant 0 : i32
    %c0_i32_1 = arith.constant 0 : i32
    return %c0_i32, %c0_i32_0 : i32, i32
  }
  func.func @transform_2(%arg0: i32) -> (i32, i32, i32) {
    %c0_i32 = arith.constant 0 : i32
    %c0_i32_0 = arith.constant 0 : i32
    %c0_i32_1 = arith.constant 0 : i32
    %c0_i32_2 = arith.constant 0 : i32
    return %c0_i32, %c0_i32_0, %c0_i32_1 : i32, i32, i32
  }
  func.func @transform_3(%arg0: i32) -> (i32, i32, i32) {
    %c0_i32 = arith.constant 0 : i32
    %c0_i32_0 = arith.constant 0 : i32
    %c0_i32_1 = arith.constant 0 : i32
    %c0_i32_2 = arith.constant 0 : i32
    return %c0_i32, %c0_i32_0, %c0_i32_1 : i32, i32, i32
  }
  func.func @transform_4(%arg0: i32) -> (i32, i32, i32) {
    %c0_i32 = arith.constant 0 : i32
    %c0_i32_0 = arith.constant 0 : i32
    %c0_i32_1 = arith.constant 0 : i32
    %c0_i32_2 = arith.constant 0 : i32
    return %c0_i32, %c0_i32_0, %c0_i32_1 : i32, i32, i32
  }
  func.func @transform_5(%arg0: i32) -> (i32, i32, i32) {
    %c0_i32 = arith.constant 0 : i32
    %c0_i32_0 = arith.constant 0 : i32
    %c0_i32_1 = arith.constant 0 : i32
    %c0_i32_2 = arith.constant 0 : i32
    return %c0_i32, %c0_i32_0, %c0_i32_1 : i32, i32, i32
  }
  func.func @transform_6(%arg0: i32) -> (i32, i32, i32) {
    %c0_i32 = arith.constant 0 : i32
    %c0_i32_0 = arith.constant 0 : i32
    %c0_i32_1 = arith.constant 0 : i32
    %c0_i32_2 = arith.constant 0 : i32
    return %c0_i32, %c0_i32_0, %c0_i32_1 : i32, i32, i32
  }
  func.func @transform_7(%arg0: i32) -> (i32, i32, i32) {
    %c0_i32 = arith.constant 0 : i32
    %c0_i32_0 = arith.constant 0 : i32
    %c0_i32_1 = arith.constant 0 : i32
    %c0_i32_2 = arith.constant 0 : i32
    return %c0_i32, %c0_i32_0, %c0_i32_1 : i32, i32, i32
  }
  func.func @transform_8(%arg0: i32) -> (i32, i32, i32) {
    %c0_i32 = arith.constant 0 : i32
    %c0_i32_0 = arith.constant 0 : i32
    %c0_i32_1 = arith.constant 0 : i32
    %c0_i32_2 = arith.constant 0 : i32
    return %c0_i32, %c0_i32_0, %c0_i32_1 : i32, i32, i32
  }
  func.func @transform_9(%arg0: i32) -> (i32, i32) {
    %c0_i32 = arith.constant 0 : i32
    %c0_i32_0 = arith.constant 0 : i32
    %c0_i32_1 = arith.constant 0 : i32
    return %c0_i32, %c0_i32_0 : i32, i32
  }
  func.func @transform_10(%arg0: i32) -> (i32, i32) {
    %c0_i32 = arith.constant 0 : i32
    %c0_i32_0 = arith.constant 0 : i32
    %c0_i32_1 = arith.constant 0 : i32
    return %c0_i32, %c0_i32_0 : i32, i32
  }
  func.func @transform_11(%arg0: i32) -> (i32, i32) {
    %c0_i32 = arith.constant 0 : i32
    %c0_i32_0 = arith.constant 0 : i32
    %c0_i32_1 = arith.constant 0 : i32
    return %c0_i32, %c0_i32_0 : i32, i32
  }
  func.func @transform_12(%arg0: i32) -> (i32, i32) {
    %c0_i32 = arith.constant 0 : i32
    %c0_i32_0 = arith.constant 0 : i32
    %c0_i32_1 = arith.constant 0 : i32
    return %c0_i32, %c0_i32_0 : i32, i32
  }
  func.func @transform_13(%arg0: i32) -> (i32, i32) {
    %c0_i32 = arith.constant 0 : i32
    %c0_i32_0 = arith.constant 0 : i32
    %c0_i32_1 = arith.constant 0 : i32
    return %c0_i32, %c0_i32_0 : i32, i32
  }
  func.func @transform_14(%arg0: i32) -> (i32, i32) {
    %c0_i32 = arith.constant 0 : i32
    %c0_i32_0 = arith.constant 0 : i32
    %c0_i32_1 = arith.constant 0 : i32
    return %c0_i32, %c0_i32_0 : i32, i32
  }
  func.func @transform_15(%arg0: i32) -> (i32, i32) {
    %c0_i32 = arith.constant 0 : i32
    %c0_i32_0 = arith.constant 0 : i32
    %c0_i32_1 = arith.constant 0 : i32
    return %c0_i32, %c0_i32_0 : i32, i32
  }
  func.func @transform_16(%arg0: i32) -> (i32, i32) {
    %c0_i32 = arith.constant 0 : i32
    %c0_i32_0 = arith.constant 0 : i32
    %c0_i32_1 = arith.constant 0 : i32
    return %c0_i32, %c0_i32_0 : i32, i32
  }
  func.func @transform_17(%arg0: i32) -> (i32, i32) {
    %c0_i32 = arith.constant 0 : i32
    %c0_i32_0 = arith.constant 0 : i32
    %c0_i32_1 = arith.constant 0 : i32
    return %c0_i32, %c0_i32_0 : i32, i32
  }
  func.func @transform_18(%arg0: i32) -> (i32, i32) {
    %c0_i32 = arith.constant 0 : i32
    %c0_i32_0 = arith.constant 0 : i32
    %c0_i32_1 = arith.constant 0 : i32
    return %c0_i32, %c0_i32_0 : i32, i32
  }
}

</mosaic_0001>

<bundles_post_ra>
// kernel: decoder_layer_forward.1
= control target key start
LH: loop header
LB: loop body
LE: loop exit
PB: predicated region body
PF: predicated region fallthrough
CT: control target
= control target key end

     0   :  { %s4150_s0 = inlined_call_operand.vmem [shape: f32[16,32], index: 0, kind: input, shape index: {}]   ;;  %s4151_s1 = inlined_call_operand.vmem [shape: f32[16,32], index: 1, kind: input, shape index: {}]   ;;  %s4152_s2 = inlined_call_operand.vmem [shape: f32[4,32,8], index: 2, kind: input, shape index: {}]   ;;  %s4153_s3 = inlined_call_operand.vmem [shape: f32[4,1,8], index: 3, kind: input, shape index: {}]   ;;  %s4154_s4 = inlined_call_operand.vmem [shape: f32[4,32,8], index: 4, kind: input, shape index: {}]   ;;  %s4155_s5 = inlined_call_operand.vmem [shape: f32[4,1,8], index: 5, kind: input, shape index: {}]   ;;  %s4156_s6 = inlined_call_operand.vmem [shape: f32[4,32,8], index: 6, kind: input, shape index: {}]   ;;  %s4157_s7 = inlined_call_operand.vmem [shape: f32[4,1,8], index: 7, kind: input, shape index: {}]   ;;  %s4158_s8 = inlined_call_operand.vmem [shape: f32[4,8,32], index: 8, kind: input, shape index: {}]   ;;  %s4159_s9 = inlined_call_operand.vmem [shape: f32[1,32], index: 9, kind: input, shape index: {}]   ;;  %s4160_s10 = inlined_call_operand.vmem [shape: f32[32,64], index: 10, kind: input, shape index: {}]   ;;  %s4161_s11 = inlined_call_operand.vmem [shape: f32[1,64], index: 11, kind: input, shape index: {}]   ;;  %s4162_s12 = inlined_call_operand.vmem [shape: f32[64,32], index: 12, kind: input, shape index: {}]   ;;  %s4163_s13 = inlined_call_operand.vmem [shape: f32[1,32], index: 13, kind: input, shape index: {}]   ;;  %s4164_s14 = inlined_call_operand.vmem [shape: f32[1,32], index: 14, kind: input, shape index: {}]   ;;  %s4165_s15 = inlined_call_operand.vmem [shape: f32[1,32], index: 15, kind: input, shape index: {}]   ;;  %s4166_s16 = inlined_call_operand.vmem [shape: f32[1,32], index: 16, kind: input, shape index: {}]   ;;  %s4167_s17 = inlined_call_operand.vmem [shape: f32[1,32], index: 17, kind: input, shape index: {}]   ;;  %s4168_s18 = inlined_call_operand.hbm [shape: f32[16,32], index: 18, kind: output, shape index: {}]  }
   0x1   :  { %4172 = sst [smem:[#allocation5_spill]] %s4150_s0 }
   0x2   :  { %4173 = sst [smem:[#allocation6_spill]] %s4151_s1 }
   0x3   :  { %4174 = sst [smem:[#allocation7_spill]] %s4152_s2 }
   0x4   :  { %v209_v0 = vld [vmem:[%s4154_s4] sm:$0xff]  ;;  %v210_v1 = vld [vmem:[%s4154_s4 + $0x8] sm:$0xff]  ;;  %v211_v2 = vld [vmem:[%s4154_s4 + $0x10] sm:$0xff]  ;;  %vm127_vm0 = vcmask 261120   ;;  %s4175_s2 = sld [smem:[#allocation6_spill]]  ;;  %s4176_s25 = sld [smem:[#allocation5_spill]] }
   0x5   :  { %v3308_v3 = vpack.c.bf16 %v210_v1, %v209_v0  ;;  %v212_v4 = vld [vmem:[%s4154_s4 + $0x18] sm:$0xff]  ;;  %s4177_s28 = sld [smem:[#allocation7_spill]] }
   0x6   :  { %v3312_v6 = vpack.c.bf16 %v212_v4, %v211_v2 }
   0x7   :  { %3309 = vmatprep.subr.bf16.mxu1 %v3308_v3 }
   0x8   :  { %3311 = vmatpush3.bf16.msra.mxu1 %v3308_v3 }
   0xa   :  { %v3688_v5 = vld [vmem:[%s4175_s2] sm:$0xff] }
   0xb   :  { %3025 = vmatprep.mubr.msk.f32.mxu1 %vm127_vm0, %v3688_v5  ;;  %v3695_v7 = vld [vmem:[%s4176_s25] sm:$0xff]  ;;  %v117_v9 = vld [vmem:[%s4177_s28 + $0x8] sm:$0xff]  ;;  %v118_v10 = vld [vmem:[%s4177_s28 + $0x10] sm:$0xff] }
   0xc   :  { %v116_v8 = vld [vmem:[%s4177_s28] sm:$0xff]  ;;  %v119_v11 = vld [vmem:[%s4177_s28 + $0x18] sm:$0xff]  ;;  %3014 = vmatprep.mubr.msk.f32.mxu0 %vm127_vm0, %v3695_v7 }
   0xd   :  { %v3300_v12 = vpack.c.bf16 %v117_v9, %v116_v8  ;;  %v3304_v13 = vpack.c.bf16 %v119_v11, %v118_v10 }
   0xe   :  { %23 = vsyncpa [#allocation3], 0  ;;  %3313 = vmatprep.subr.bf16.mxu1 %v3312_v6  ;;  %v3714_v14 = vld [vmem:[%s4175_s2 + $0x8] sm:$0xff]  ;;  %v2695_v16 = vld [vmem:[%s4155_s5] ss:$0 sm:$0xff]  ;;  %vm407_vm1 = vcmask 64512   ;;  %v64_v39 = vlaneseq }
   0xf   :  { %3301 = vmatprep.subr.bf16.mxu0 %v3300_v12  ;;  %3315 = vmatpush3.bf16.msra.mxu1 %v3312_v6  ;;  %v3723_v15 = vld [vmem:[%s4176_s25 + $0x8] sm:$0xff]  ;;  %v2692_v21 = vld [vmem:[%s4153_s3] ss:$0 sm:$0xff]  ;;  %vm3739_vm2 = vmpackc.low %vm407_vm1, %vm407_vm1  ;;  %vm2545_vm5 = vcmask 523264  }
  0x10   :  { %3303 = vmatpush3.bf16.msra.mxu0 %v3300_v12  ;;  %v311_v33 = vld [vmem:[%s4156_s6] sm:$0xff]  ;;  %v312_v34 = vld [vmem:[%s4156_s6 + $0x8] sm:$0xff]  ;;  %v313_v35 = vld [vmem:[%s4156_s6 + $0x10] sm:$0xff]  ;;  %v65_v40 = vshrl.u32 %v64_v39, 7  ;;  %v68_v41 = vand.u32 127, %v64_v39 }
  0x11   :  { %3305 = vmatprep.subr.bf16.mxu0 %v3304_v13  ;;  %v3316_v36 = vpack.c.bf16 %v312_v34, %v311_v33  ;;  %v314_v37 = vld [vmem:[%s4156_s6 + $0x18] sm:$0xff]  ;;  %v2700_v1 = vld [vmem:[%s4157_s7] ss:$0 sm:$0xff] }
  0x12   :  { %3026 = vmatmul.mubr.msk.f32.vlgmr.msra.gmra.mrb[0].mxu1 %vm127_vm0, %v3714_v14  ;;  %v3320_v38 = vpack.c.bf16 %v314_v37, %v313_v35  ;;  %v66_v42 = vadd.s32 8, %v65_v40  ;;  %v97_v43 = vand.u32 1, %v68_v41  ;;  %v73_v44 = vand.u32 1, %v65_v40  ;;  %v2726_v33 = vld [vmem:[%s4154_s4 + $0x38] sm:$0xff] }
  0x13   :  { %3028 = vmatprep.mubr.msk.f32.mxu1 %vm127_vm0, %v3695_v7  ;;  %v2814_v22 = vld [vmem:[%s4156_s6 + $0x78] sm:$0xff] }
  0x14   :  { %3307 = vmatpush3.bf16.msra.mxu0 %v3304_v13  ;;  %v80_v45 = vand.u32 1, %v66_v42  ;;  %vm3773_vm3 = vcmp.eq.s32.totalorder %v73_v44, %v97_v43  ;;  %v606_v13 = vld [vmem:[%s4158_s8] sm:$0xff] }
  0x15   :  { %3317 = vmatprep.subr.bf16.mxu0 %v3316_v36  ;;  %v2728_v42 = vld [vmem:[%s4155_s5 + $0x1] ss:$0 sm:$0xff] }
  0x16   :  { %3029 = vmatmul.mubr.msk.f32.gmra.mrb[2].mxu1 %vm127_vm0, %v3723_v15  ;;  %vm3777_vm4 = vcmp.eq.s32.totalorder %v80_v45, %v97_v43 }
  0x17   :  { %3015 = vmatmul.mubr.msk.f32.vlgmr.msra.gmra.mrb[0].mxu0 %vm127_vm0, %v3723_v15 }
  0x18   :  { %3039 = vmatprep.mubr.msk.f32.mxu0 %vm127_vm0, %v3688_v5  ;;  %3319 = vmatpush3.bf16.msra.mxu0 %v3316_v36 }
  0x19   :  { %3321 = vmatprep.subr.bf16.mxu0 %v3320_v38 }
  0x1c   :  { %3323 = vmatpush3.bf16.msra.mxu0 %v3320_v38  ;;  %v2720_v38 = vld [vmem:[%s4153_s3 + $0x1] ss:$0 sm:$0xff] }
  0x1f   :  { %3040 = vmatmul.mubr.msk.f32.vlgmr.msra.gmra.mrb[2].mxu0 %vm127_vm0, %v3714_v14 }
  0x20   :  { %3042 = vmatprep.mubr.msk.f32.mxu0 %vm127_vm0, %v3695_v7 }
  0x23   :  { %3043 = vmatmul.mubr.msk.f32.gmra.mrb[4].mxu0 %vm127_vm0, %v3723_v15 }
  0xe5   :  { %v3027_v17 = vpop.f32.mrb[0].mxu1 }
  0xe6   :  { %v298_v18 = vadd.f32 %v3027_v17, %v2695_v16  ;;  %v292_v19 = vpop.f32.mrb[1].mxu1 }
  0xe7   :  { %v293_v20 = vadd.f32 %v2695_v16, %v292_v19 }
  0xe9   :  { %v3324_v24 = vpack.c.bf16 %v298_v18, %v293_v20  ;;  %v3030_v25 = vpop.f32.mrb[2].mxu1 }
  0xea   :  { %v3016_v23 = vpop.f32.mrb[0].mxu0  ;;  %v308_v27 = vadd.f32 %v3030_v25, %v2695_v16  ;;  %v302_v28 = vpop.f32.mrb[3].mxu1 }
  0xeb   :  { %v200_v26 = vpop.f32.mrb[1].mxu0  ;;  %3326 = vmatprep.subr.msk.bf16.mxu1 %vm3739_vm2, %v3324_v24  ;;  %v303_v30 = vadd.f32 %v2695_v16, %v302_v28  ;;  %v206_v32 = vadd.f32 %v3016_v23, %v2692_v21  ;;  %v2723_v23 = vld [vmem:[%s4154_s4 + $0x20] sm:$0xff]  ;;  %v2717_v28 = vld [vmem:[%s4177_s28 + $0x30] sm:$0xff] }
  0xec   :  { %v201_v29 = vadd.f32 %v2692_v21, %v200_v26  ;;  %3329 = vmatpush3.bf16.xpose.msk.msra.mxu1 %vm3739_vm2, %v3324_v24  ;;  %v2724_v24 = vld [vmem:[%s4154_s4 + $0x28] sm:$0xff]  ;;  %v2715_v26 = vld [vmem:[%s4177_s28 + $0x20] sm:$0xff] }
  0xed   :  { %v3330_v31 = vpack.c.bf16 %v308_v27, %v303_v30  ;;  %v3352_v25 = vpack.c.bf16 %v2724_v24, %v2723_v23  ;;  %v2716_v27 = vld [vmem:[%s4177_s28 + $0x28] sm:$0xff]  ;;  %v2718_v30 = vld [vmem:[%s4177_s28 + $0x38] sm:$0xff] }
  0xee   :  { %3053 = vmatprep.mubr.msk.f32.mxu1 %vm407_vm1, %v201_v29  ;;  %v3344_v29 = vpack.c.bf16 %v2716_v27, %v2715_v26 }
  0xef   :  { %3332 = vmatprep.subr.msk.bf16.mxu1 %vm3739_vm2, %v3330_v31 }
  0xf2   :  { %v3041_v0 = vpop.f32.mrb[2].mxu0 }
  0xf3   :  { %v394_v2 = vadd.f32 %v3041_v0, %v2700_v1  ;;  %v388_v3 = vpop.f32.mrb[3].mxu0 }
  0xf4   :  { %3335 = vmatpush3.bf16.xpose.msk.msra.mxu1 %vm3739_vm2, %v3330_v31  ;;  %v389_v4 = vadd.f32 %v2700_v1, %v388_v3  ;;  %v3348_v31 = vpack.c.bf16 %v2718_v30, %v2717_v28  ;;  %v2738_v3 = vld [vmem:[%s4157_s7 + $0x1] ss:$0 sm:$0xff] }
  0xf5   :  { %3345 = vmatprep.subr.bf16.mxu1 %v3344_v29 }
  0xf6   :  { %v3336_v6 = vpack.c.bf16 %v394_v2, %v389_v4  ;;  %v3044_v8 = vpop.f32.mrb[4].mxu0 }
  0xf7   :  { %v398_v9 = vpop.f32.mrb[5].mxu0  ;;  %v404_v10 = vadd.f32 %v3044_v8, %v2700_v1 }
  0xf8   :  { %3337 = vmatprep.subr.bf16.mxu0 %v3336_v6  ;;  %v399_v11 = vadd.f32 %v2700_v1, %v398_v9 }
  0xf9   :  { %3339 = vmatpush3.bf16.msra.mxu0 %v3336_v6 }
  0xfa   :  { %v3340_v12 = vpack.c.bf16 %v404_v10, %v399_v11 }
  0xfb   :  { %3054 = vmatmul.mubr.msk.f32.vlgmr.msra.gmra.mrb[4].mxu1 %vm407_vm1, %v206_v32  ;;  %v2725_v32 = vld [vmem:[%s4154_s4 + $0x30] sm:$0xff] }
  0xfc   :  { %3080 = vmatprep.mubr.msk.f32.mxu1 %vm127_vm0, %v3695_v7  ;;  %3341 = vmatprep.subr.bf16.mxu0 %v3340_v12  ;;  %v3356_v36 = vpack.c.bf16 %v2726_v33, %v2725_v32 }
  0xfd   :  { %3343 = vmatpush3.bf16.msra.mxu0 %v3340_v12  ;;  %3347 = vmatpush3.bf16.msra.mxu1 %v3344_v29  ;;  %v2751_v29 = vld [vmem:[%s4158_s8 + $0x8] sm:$0xff] }
  0xfe   :  { %3067 = vmatprep.subr.mxu0 %v606_v13  ;;  %3349 = vmatprep.subr.bf16.mxu1 %v3348_v31 }
 0x101   :  { %3351 = vmatpush3.bf16.msra.mxu1 %v3348_v31 }
 0x104   :  { %3081 = vmatmul.mubr.msk.f32.vlgmr.msra.gmra.mrb[6].mxu1 %vm127_vm0, %v3723_v15 }
 0x105   :  { %3105 = vmatprep.mubr.msk.f32.mxu1 %vm127_vm0, %v3688_v5 }
 0x1ce   :  { %v3055_v47 = vpop.f32.mrb[4].mxu1 }
 0x1cf   :  { %v492_v49 = vpop.f32.mrb[5].mxu1  ;;  %v502_v52 = vsel %vm3777_vm4, %v3055_v47, -1e+30 }
 0x1d0   :  { %v501_v50 = vsel %vm3773_vm3, %v492_v49, -1e+30  ;;  %v506_v53 = vsel %vm127_vm0, %v502_v52, -inf }
 0x1d1   :  { %v503_v51 = vsel %vm127_vm0, %v501_v50, -inf }
 0x1d2   :  { %504 = vmax.xlane.f32.xlu0 %v503_v51 }
 0x1d6   :  { %507 = vmax.xlane.f32.xlu0 %v506_v53 }
 0x1d7   :  { %v3082_v37 = vpop.f32.mrb[6].mxu1 }
 0x1d8   :  { %v775_v39 = vadd.f32 %v3082_v37, %v2720_v38  ;;  %v769_v40 = vpop.f32.mrb[7].mxu1  ;;  %v2763_v37 = vld [vmem:[%s4154_s4 + $0x48] sm:$0xff] }
 0x1d9   :  { %v770_v41 = vadd.f32 %v2720_v38, %v769_v40  ;;  %v2755_v40 = vld [vmem:[%s4177_s28 + $0x48] sm:$0xff] }
 0x25f   :  { %v505_v54 = vpop.xlane.xlu0 %504 }
 0x260   :  { %v509_v55 = vsub.f32 %v501_v50, %v505_v54 }
 0x262   :  { %v511_v56 = vmul.f32 1.442695, %v509_v55  ;;  %v2733_v55 = vld [vmem:[%s4156_s6 + $0x20] sm:$0xff] }
 0x263   :  { %v508_v57 = vpop.xlane.xlu0 %507 }
 0x264   :  { %3511 = vpow2.f32 %v511_v56  ;;  %v510_v58 = vsub.f32 %v502_v52, %v508_v57  ;;  %v2734_v56 = vld [vmem:[%s4156_s6 + $0x28] sm:$0xff]  ;;  %v2735_v57 = vld [vmem:[%s4156_s6 + $0x30] sm:$0xff] }
 0x266   :  { %v513_v59 = vmul.f32 1.442695, %v510_v58  ;;  %v3360_v58 = vpack.c.bf16 %v2734_v56, %v2733_v55 }
 0x268   :  { %3513 = vpow2.f32 %v513_v59  ;;  %v2736_v59 = vld [vmem:[%s4156_s6 + $0x38] sm:$0xff]  ;;  %3361 = vmatprep.subr.bf16.mxu1 %v3360_v58 }
 0x269   :  { %3363 = vmatpush3.bf16.msra.mxu1 %v3360_v58 }
 0x26e   :  { %v3512_v60 = vpop.eup %3511 }
 0x26f   :  { %v515_v61 = vsel %vm127_vm0, %v3512_v60, 0.0 }
 0x270   :  { %516 = vadd.xlane.f32.xlu1 %v515_v61 }
 0x272   :  { %v3514_v62 = vpop.eup %3513 }
 0x273   :  { %v518_v63 = vsel %vm127_vm0, %v3514_v62, 0.0 }
 0x274   :  { %519 = vadd.xlane.f32.xlu1 %v518_v63 }
 0x2fd   :  { %v517_v16 = vpop.xlane.xlu1 %516 }
 0x2fe   :  { %3515 = vrcp.f32 %v517_v16 }
 0x301   :  { %v520_v17 = vpop.xlane.xlu1 %519 }
 0x302   :  { %3517 = vrcp.f32 %v520_v17 }
 0x308   :  { %v3516_v18 = vpop.eup %3515 }
 0x309   :  { %v523_v19 = vmul.f32 %v3516_v18, %v3512_v60  ;;  %v3364_v60 = vpack.c.bf16 %v2736_v59, %v2735_v57  ;;  %v2767_v57 = vld [vmem:[%s4155_s5 + $0x2] ss:$0 sm:$0xff] }
 0x30b   :  { %3064 = vmatprep.mubr.msk.f32.mxu0 %vm127_vm0, %v523_v19  ;;  %3365 = vmatprep.subr.bf16.mxu1 %v3364_v60 }
 0x30c   :  { %v3518_v20 = vpop.eup %3517  ;;  %3367 = vmatpush3.bf16.msra.mxu1 %v3364_v60 }
 0x30d   :  { %v524_v21 = vmul.f32 %v3518_v20, %v3514_v62 }
 0x30f   :  { %3065 = vmatmul.mubr.msk.f32.vlgmr.msra.gmra.mrb[6].mxu0 %vm127_vm0, %v524_v21  ;;  %3106 = vmatmul.mubr.msk.f32.vlgmr.msra.gmra.mrb[8].mxu1 %vm127_vm0, %v3714_v14 }
 0x310   :  { %3068 = vmatpush3.msra.mxu0 %v606_v13  ;;  %3108 = vmatprep.mubr.msk.f32.mxu1 %vm127_vm0, %v3695_v7 }
 0x311   :  { %3353 = vmatprep.subr.bf16.mxu0 %v3352_v25 }
 0x313   :  { %3109 = vmatmul.mubr.msk.f32.gmra.mrb[10].mxu1 %vm127_vm0, %v3723_v15 }
 0x3e2   :  { %v3066_v34 = vpop.f32.mrb[6].mxu0  ;;  %v3107_v4 = vpop.f32.mrb[8].mxu1 }
 0x3e3   :  { %v597_v35 = vpop.f32.mrb[7].mxu0  ;;  %v961_v6 = vadd.f32 %v3107_v4, %v2738_v3  ;;  %v955_v8 = vpop.f32.mrb[9].mxu1  ;;  %v2772_v4 = vld [vmem:[%s4156_s6 + $0x40] sm:$0xff] }
 0x3e4   :  { %3069 = vmatprep.mubr.msk.f32.mxu0 %vm407_vm1, %v597_v35  ;;  %v956_v9 = vadd.f32 %v2738_v3, %v955_v8  ;;  %v2774_v8 = vld [vmem:[%s4156_s6 + $0x50] sm:$0xff] }
 0x3e5   :  { %3070 = vmatmul.mubr.msk.f32.vlgmr.msra.gmra.mrb[8].mxu0 %vm407_vm1, %v3066_v34 }
 0x3e6   :  { %3355 = vmatpush3.bf16.msra.mxu0 %v3352_v25  ;;  %3091 = vmatprep.mubr.msk.f32.mxu0 %vm127_vm0, %v3688_v5  ;;  %v3380_v10 = vpack.c.bf16 %v961_v6, %v956_v9  ;;  %v3110_v24 = vpop.f32.mrb[10].mxu1  ;;  %v2773_v6 = vld [vmem:[%s4156_s6 + $0x48] sm:$0xff] }
 0x3e7   :  { %3357 = vmatprep.subr.bf16.mxu0 %v3356_v36  ;;  %v965_v25 = vpop.f32.mrb[11].mxu1  ;;  %v971_v26 = vadd.f32 %v3110_v24, %v2738_v3  ;;  %v3404_v9 = vpack.c.bf16 %v2773_v6, %v2772_v4  ;;  %v2806_v6 = vld [vmem:[%s4155_s5 + $0x3] ss:$0 sm:$0xff] }
 0x3e8   :  { %3381 = vmatprep.subr.bf16.mxu1 %v3380_v10  ;;  %v966_v27 = vadd.f32 %v2738_v3, %v965_v25 }
 0x3e9   :  { %3383 = vmatpush3.bf16.msra.mxu1 %v3380_v10  ;;  %v2775_v10 = vld [vmem:[%s4156_s6 + $0x58] sm:$0xff] }
 0x3ea   :  { %3359 = vmatpush3.bf16.msra.mxu0 %v3356_v36  ;;  %v3384_v28 = vpack.c.bf16 %v971_v26, %v966_v27  ;;  %v2762_v36 = vld [vmem:[%s4154_s4 + $0x40] sm:$0xff] }
 0x3eb   :  { %v3396_v38 = vpack.c.bf16 %v2763_v37, %v2762_v36 }
 0x3ec   :  { %3385 = vmatprep.subr.bf16.mxu1 %v3384_v28 }
 0x3ed   :  { %3092 = vmatmul.mubr.msk.f32.vlgmr.msra.gmra.mrb[10].mxu0 %vm127_vm0, %v3714_v14  ;;  %3387 = vmatpush3.bf16.msra.mxu1 %v3384_v28 }
 0x3ee   :  { %3094 = vmatprep.mubr.msk.f32.mxu0 %vm127_vm0, %v3695_v7 }
 0x3f1   :  { %3095 = vmatmul.mubr.msk.f32.gmra.mrb[12].mxu0 %vm127_vm0, %v3723_v15 }
 0x3f2   :  { %3119 = vmatprep.mubr.msk.f32.mxu0 %vm407_vm1, %v770_v41  ;;  %v2756_v41 = vld [vmem:[%s4177_s28 + $0x50] sm:$0xff] }
 0x4c0   :  { %v3093_v43 = vpop.f32.mrb[10].mxu0 }
 0x4c1   :  { %v863_v44 = vadd.f32 %v3093_v43, %v2728_v42  ;;  %v857_v45 = vpop.f32.mrb[11].mxu0  ;;  %v2757_v43 = vld [vmem:[%s4177_s28 + $0x58] sm:$0xff] }
 0x4c2   :  { %v858_v47 = vadd.f32 %v2728_v42, %v857_v45  ;;  %v2764_v45 = vld [vmem:[%s4154_s4 + $0x50] sm:$0xff] }
 0x4c4   :  { %v3368_v49 = vpack.c.bf16 %v863_v44, %v858_v47  ;;  %v3096_v50 = vpop.f32.mrb[12].mxu0  ;;  %v3392_v44 = vpack.c.bf16 %v2757_v43, %v2756_v41  ;;  %v2765_v47 = vld [vmem:[%s4154_s4 + $0x58] sm:$0xff]  ;;  %v2794_v43 = vld [vmem:[%s4177_s28 + $0x68] sm:$0xff] }
 0x4c5   :  { %v873_v51 = vadd.f32 %v3096_v50, %v2728_v42  ;;  %v867_v52 = vpop.f32.mrb[13].mxu0 }
 0x4c6   :  { %3370 = vmatprep.subr.msk.bf16.mxu0 %vm3739_vm2, %v3368_v49  ;;  %v868_v53 = vadd.f32 %v2728_v42, %v867_v52 }
 0x4c7   :  { %3373 = vmatpush3.bf16.xpose.msk.msra.mxu0 %vm3739_vm2, %v3368_v49 }
 0x4c8   :  { %v3374_v54 = vpack.c.bf16 %v873_v51, %v868_v53  ;;  %v3400_v51 = vpack.c.bf16 %v2765_v47, %v2764_v45  ;;  %v2759_v53 = vld [vmem:[%s4153_s3 + $0x2] ss:$0 sm:$0xff] }
 0x4ca   :  { %3376 = vmatprep.subr.msk.bf16.mxu0 %vm3739_vm2, %v3374_v54 }
 0x4cf   :  { %3379 = vmatpush3.bf16.xpose.msk.msra.mxu0 %vm3739_vm2, %v3374_v54 }
 0x4d0   :  { %3133 = vmatprep.subr.mxu0 %v2751_v29 }
 0x4d6   :  { %3120 = vmatmul.mubr.msk.f32.vlgmr.msra.gmra.mrb[14].mxu0 %vm407_vm1, %v775_v39  ;;  %v2754_v39 = vld [vmem:[%s4177_s28 + $0x40] sm:$0xff] }
 0x4d7   :  { %3134 = vmatpush3.msra.mxu0 %v2751_v29  ;;  %v3388_v42 = vpack.c.bf16 %v2755_v40, %v2754_v39 }
 0x4d8   :  { %3397 = vmatprep.subr.bf16.mxu0 %v3396_v38 }
 0x4d9   :  { %3389 = vmatprep.subr.bf16.mxu1 %v3388_v42 }
 0x5a9   :  { %v3121_v61 = vpop.f32.mrb[14].mxu0 }
 0x5aa   :  { %v1068_v62 = vsel %vm3777_vm4, %v3121_v61, -1e+30  ;;  %v1058_v63 = vpop.f32.mrb[15].mxu0 }
 0x5ab   :  { %v1067_v0 = vsel %vm3773_vm3, %v1058_v63, -1e+30  ;;  %v1072_v1 = vsel %vm127_vm0, %v1068_v62, -inf }
 0x5ac   :  { %1073 = vmax.xlane.f32.xlu1 %v1072_v1  ;;  %v1069_v2 = vsel %vm127_vm0, %v1067_v0, -inf }
 0x5ad   :  { %1070 = vmax.xlane.f32.xlu0 %v1069_v2 }
 0x639   :  { %v1074_v11 = vpop.xlane.xlu1 %1073 }
 0x63a   :  { %v1076_v12 = vsub.f32 %v1068_v62, %v1074_v11  ;;  %v1071_v13 = vpop.xlane.xlu0 %1070  ;;  %v3408_v11 = vpack.c.bf16 %v2775_v10, %v2774_v8 }
 0x63b   :  { %v1075_v16 = vsub.f32 %v1067_v0, %v1071_v13 }
 0x63c   :  { %v1079_v17 = vmul.f32 1.442695, %v1076_v12 }
 0x63d   :  { %v1077_v18 = vmul.f32 1.442695, %v1075_v16 }
 0x63e   :  { %3519 = vpow2.f32 %v1079_v17 }
 0x63f   :  { %3521 = vpow2.f32 %v1077_v18 }
 0x648   :  { %v3520_v19 = vpop.eup %3519 }
 0x649   :  { %v3522_v20 = vpop.eup %3521  ;;  %v1084_v21 = vsel %vm127_vm0, %v3520_v19, 0.0 }
 0x64a   :  { %1085 = vadd.xlane.f32.xlu1 %v1084_v21  ;;  %v1081_v23 = vsel %vm127_vm0, %v3522_v20, 0.0 }
 0x64b   :  { %1082 = vadd.xlane.f32.xlu0 %v1081_v23 }
 0x6d7   :  { %v1086_v30 = vpop.xlane.xlu1 %1085 }
 0x6d8   :  { %3523 = vrcp.f32 %v1086_v30  ;;  %v1083_v31 = vpop.xlane.xlu0 %1082 }
 0x6d9   :  { %3525 = vrcp.f32 %v1083_v31 }
 0x6e2   :  { %v3524_v32 = vpop.eup %3523 }
 0x6e3   :  { %v3526_v33 = vpop.eup %3525  ;;  %v1090_v35 = vmul.f32 %v3524_v32, %v3520_v19 }
 0x6e4   :  { %v1089_v34 = vmul.f32 %v3526_v33, %v3522_v20  ;;  %v2777_v20 = vld [vmem:[%s4157_s7 + $0x2] ss:$0 sm:$0xff] }
 0x6e6   :  { %3130 = vmatprep.mubr.msk.f32.mxu1 %vm127_vm0, %v1089_v34 }
 0x6e7   :  { %3131 = vmatmul.mubr.msk.f32.vlgmr.msra.gmra.mrb[12].mxu1 %vm127_vm0, %v1090_v35 }
 0x6e8   :  { %3146 = vmatprep.mubr.msk.f32.mxu1 %vm127_vm0, %v3695_v7  ;;  %3391 = vmatpush3.bf16.msra.mxu1 %v3388_v42  ;;  %v2793_v42 = vld [vmem:[%s4177_s28 + $0x60] sm:$0xff] }
 0x6e9   :  { %3393 = vmatprep.subr.bf16.mxu1 %v3392_v44 }
 0x6ec   :  { %3395 = vmatpush3.bf16.msra.mxu1 %v3392_v44  ;;  %v3432_v44 = vpack.c.bf16 %v2794_v43, %v2793_v42 }
 0x6ed   :  { %3405 = vmatprep.subr.bf16.mxu1 %v3404_v9 }
 0x6ef   :  { %3147 = vmatmul.mubr.msk.f32.vlgmr.msra.gmra.mrb[14].mxu1 %vm127_vm0, %v3723_v15 }
 0x6f0   :  { %3171 = vmatprep.mubr.msk.f32.mxu1 %vm127_vm0, %v3688_v5  ;;  %3407 = vmatpush3.bf16.msra.mxu1 %v3404_v9 }
 0x6f1   :  { %3409 = vmatprep.subr.bf16.mxu1 %v3408_v11 }
 0x6f4   :  { %3411 = vmatpush3.bf16.msra.mxu1 %v3408_v11 }
 0x6f7   :  { %3172 = vmatmul.mubr.msk.f32.vlgmr.msra.gmra.mrb[16].mxu1 %vm127_vm0, %v3714_v14 }
 0x6f8   :  { %3174 = vmatprep.mubr.msk.f32.mxu1 %vm127_vm0, %v3695_v7 }
 0x6fb   :  { %3175 = vmatmul.mubr.msk.f32.gmra.mrb[18].mxu1 %vm127_vm0, %v3723_v15 }
 0x7ba   :  { %v3132_v49 = vpop.f32.mrb[12].mxu1 }
 0x7bb   :  { %v1163_v50 = vpop.f32.mrb[13].mxu1 }
 0x7bc   :  { %3135 = vmatprep.mubr.msk.f32.mxu0 %vm407_vm1, %v1163_v50  ;;  %v2795_v50 = vld [vmem:[%s4177_s28 + $0x70] sm:$0xff] }
 0x7bd   :  { %3136 = vmatmul.mubr.msk.f32.vlgmr.msra.gmra.mrb[8].mxu0 %vm407_vm1, %v3132_v49 }
 0x7be   :  { %3399 = vmatpush3.bf16.msra.mxu0 %v3396_v38  ;;  %3157 = vmatprep.mubr.msk.f32.mxu0 %vm127_vm0, %v3688_v5 }
 0x7bf   :  { %3401 = vmatprep.subr.bf16.mxu0 %v3400_v51 }
 0x7c2   :  { %3403 = vmatpush3.bf16.msra.mxu0 %v3400_v51  ;;  %v3148_v52 = vpop.f32.mrb[14].mxu1  ;;  %v2796_v51 = vld [vmem:[%s4177_s28 + $0x78] sm:$0xff] }
 0x7c3   :  { %v1342_v54 = vadd.f32 %v3148_v52, %v2759_v53  ;;  %v1336_v55 = vpop.f32.mrb[15].mxu1 }
 0x7c4   :  { %v1337_v56 = vadd.f32 %v2759_v53, %v1336_v55  ;;  %v3436_v55 = vpack.c.bf16 %v2796_v51, %v2795_v50 }
 0x7c5   :  { %3158 = vmatmul.mubr.msk.f32.vlgmr.msra.gmra.mrb[16].mxu0 %vm127_vm0, %v3714_v14 }
 0x7c6   :  { %3160 = vmatprep.mubr.msk.f32.mxu0 %vm127_vm0, %v3695_v7 }
 0x7c9   :  { %3161 = vmatmul.mubr.msk.f32.gmra.mrb[18].mxu0 %vm127_vm0, %v3723_v15 }
 0x7ca   :  { %3185 = vmatprep.mubr.msk.f32.mxu0 %vm407_vm1, %v1337_v56  ;;  %v3173_v21 = vpop.f32.mrb[16].mxu1  ;;  %v2801_v56 = vld [vmem:[%s4154_s4 + $0x60] sm:$0xff] }
 0x7cb   :  { %v1528_v23 = vadd.f32 %v3173_v21, %v2777_v20  ;;  %v1522_v24 = vpop.f32.mrb[17].mxu1  ;;  %v2812_v21 = vld [vmem:[%s4156_s6 + $0x68] sm:$0xff] }
 0x7cc   :  { %v1523_v25 = vadd.f32 %v2777_v20, %v1522_v24 }
 0x7ce   :  { %v3424_v26 = vpack.c.bf16 %v1528_v23, %v1523_v25  ;;  %v3176_v37 = vpop.f32.mrb[18].mxu1  ;;  %v2813_v23 = vld [vmem:[%s4156_s6 + $0x70] sm:$0xff] }
 0x7cf   :  { %v1532_v38 = vpop.f32.mrb[19].mxu1  ;;  %v1538_v39 = vadd.f32 %v3176_v37, %v2777_v20  ;;  %v3452_v25 = vpack.c.bf16 %v2814_v22, %v2813_v23  ;;  %v2531_v22 = vld [vmem:[%s4162_s12 + $0x8] sm:$0xff] }
 0x7d0   :  { %3425 = vmatprep.subr.bf16.mxu1 %v3424_v26  ;;  %v1533_v40 = vadd.f32 %v2777_v20, %v1532_v38  ;;  %v2811_v20 = vld [vmem:[%s4156_s6 + $0x60] sm:$0xff] }
 0x7d1   :  { %3427 = vmatpush3.bf16.msra.mxu1 %v3424_v26  ;;  %v3448_v24 = vpack.c.bf16 %v2812_v21, %v2811_v20  ;;  %v2438_v20 = vld [vmem:[%s4160_s10 + $0x10] sm:$0xff]  ;;  %v2439_v21 = vld [vmem:[%s4160_s10 + $0x18] sm:$0xff] }
 0x7d2   :  { %v3428_v41 = vpack.c.bf16 %v1538_v39, %v1533_v40  ;;  %v2816_v40 = vld [vmem:[%s4157_s7 + $0x3] ss:$0 sm:$0xff]  ;;  %v3480_v23 = vpack.c.bf16 %v2439_v21, %v2438_v20  ;;  %v2840_v20 = vld [vmem:[%s4166_s16] ss:$0 sm:$0xff] }
 0x7d4   :  { %3429 = vmatprep.subr.bf16.mxu1 %v3428_v41 }
 0x7d5   :  { %3431 = vmatpush3.bf16.msra.mxu1 %v3428_v41 }
 0x7d6   :  { %3433 = vmatprep.subr.bf16.mxu1 %v3432_v44 }
 0x898   :  { %v3159_v58 = vpop.f32.mrb[16].mxu0 }
 0x899   :  { %v1430_v59 = vadd.f32 %v3159_v58, %v2767_v57  ;;  %v1424_v60 = vpop.f32.mrb[17].mxu0 }
 0x89a   :  { %v1425_v61 = vadd.f32 %v2767_v57, %v1424_v60  ;;  %v2804_v60 = vld [vmem:[%s4154_s4 + $0x78] sm:$0xff] }
 0x89c   :  { %v3412_v62 = vpack.c.bf16 %v1430_v59, %v1425_v61  ;;  %v3162_v63 = vpop.f32.mrb[18].mxu0  ;;  %v2803_v59 = vld [vmem:[%s4154_s4 + $0x70] sm:$0xff] }
 0x89d   :  { %v1440_v0 = vadd.f32 %v3162_v63, %v2767_v57  ;;  %v1434_v1 = vpop.f32.mrb[19].mxu0  ;;  %v3444_v61 = vpack.c.bf16 %v2804_v60, %v2803_v59 }
 0x89e   :  { %3414 = vmatprep.subr.msk.bf16.mxu0 %vm3739_vm2, %v3412_v62  ;;  %v1435_v2 = vadd.f32 %v2767_v57, %v1434_v1  ;;  %v2802_v57 = vld [vmem:[%s4154_s4 + $0x68] sm:$0xff]  ;;  %v2798_v1 = vld [vmem:[%s4153_s3 + $0x3] ss:$0 sm:$0xff]  ;;  %s3575_s3 = smov [#allocation2]  }
 0x89f   :  { %3417 = vmatpush3.bf16.xpose.msk.msra.mxu0 %vm3739_vm2, %v3412_v62  ;;  %v3440_v58 = vpack.c.bf16 %v2802_v57, %v2801_v56  ;;  %v2790_v62 = vld [vmem:[%s4158_s8 + $0x10] sm:$0xff]  ;;  %s2680_s5 = sshll.u32 %s3575_s3, 4  ;;  %s2681_s5 = int_to_ptr.vmem [resolvable:$true] %s2680_s5 }
 0x8a0   :  { %v3418_v3 = vpack.c.bf16 %v1440_v0, %v1435_v2  ;;  %s3551_s2 = scalar_lea.vmem %s2681_s5, 256  ;;  %p3556_p1 = scmp.lt.s32.totalorder %s2681_s5, %s2681_s5 }
 0x8a1   :  { %p3552_p0 = scmp.ne.s32.totalorder %s2681_s5, %s3551_s2  ;;  %p3557_p2 = scmp.lt.s32.totalorder %s3551_s2, %s3551_s2 }
 0x8a2   :  { %3420 = vmatprep.subr.msk.bf16.mxu0 %vm3739_vm2, %v3418_v3 }
 0x8a3   :  { %p3558_p3 = por %p3557_p2, %p3556_p1 }
 0x8a5   :  { %p3559_p4 = pnand %p3558_p3, %p3552_p0 }
 0x8a7   :  { %3423 = vmatpush3.bf16.xpose.msk.msra.mxu0 %vm3739_vm2, %v3418_v3 }
 0x8a8   :  { %3199 = vmatprep.subr.mxu0 %v2790_v62 }
 0x8ae   :  { %3186 = vmatmul.mubr.msk.f32.vlgmr.msra.gmra.mrb[20].mxu0 %vm407_vm1, %v1342_v54 }
 0x8af   :  { %3200 = vmatpush3.msra.mxu0 %v2790_v62 }
 0x8b0   :  { %3449 = vmatprep.subr.bf16.mxu0 %v3448_v24 }
 0x981   :  { %v3187_v12 = vpop.f32.mrb[20].mxu0 }
 0x982   :  { %v1635_v13 = vsel %vm3777_vm4, %v3187_v12, -1e+30  ;;  %v1625_v16 = vpop.f32.mrb[21].mxu0 }
 0x983   :  { %v1634_v17 = vsel %vm3773_vm3, %v1625_v16, -1e+30  ;;  %v1639_v18 = vsel %vm127_vm0, %v1635_v13, -inf }
 0x984   :  { %1640 = vmax.xlane.f32.xlu1 %v1639_v18  ;;  %v1636_v19 = vsel %vm127_vm0, %v1634_v17, -inf }
 0x985   :  { %1637 = vmax.xlane.f32.xlu0 %v1636_v19 }
 0xa11   :  { %v1641_v27 = vpop.xlane.xlu1 %1640 }
 0xa12   :  { %v1643_v28 = vsub.f32 %v1635_v13, %v1641_v27  ;;  %v1638_v29 = vpop.xlane.xlu0 %1637 }
 0xa13   :  { %v1642_v30 = vsub.f32 %v1634_v17, %v1638_v29 }
 0xa14   :  { %v1646_v31 = vmul.f32 1.442695, %v1643_v28 }
 0xa15   :  { %v1644_v32 = vmul.f32 1.442695, %v1642_v30 }
 0xa16   :  { %3527 = vpow2.f32 %v1646_v31 }
 0xa17   :  { %3529 = vpow2.f32 %v1644_v32 }
 0xa20   :  { %v3528_v33 = vpop.eup %3527 }
 0xa21   :  { %v3530_v34 = vpop.eup %3529  ;;  %v1651_v35 = vsel %vm127_vm0, %v3528_v33, 0.0 }
 0xa22   :  { %1652 = vadd.xlane.f32.xlu1 %v1651_v35  ;;  %v1648_v36 = vsel %vm127_vm0, %v3530_v34, 0.0 }
 0xa23   :  { %1649 = vadd.xlane.f32.xlu0 %v1648_v36 }
 0xaaf   :  { %v1653_v45 = vpop.xlane.xlu1 %1652 }
 0xab0   :  { %3531 = vrcp.f32 %v1653_v45  ;;  %v1650_v47 = vpop.xlane.xlu0 %1649 }
 0xab1   :  { %3533 = vrcp.f32 %v1650_v47 }
 0xaba   :  { %v3532_v49 = vpop.eup %3531 }
 0xabb   :  { %v3534_v52 = vpop.eup %3533  ;;  %v1657_v54 = vmul.f32 %v3532_v49, %v3528_v33 }
 0xabc   :  { %v1656_v53 = vmul.f32 %v3534_v52, %v3530_v34  ;;  %v2829_v52 = vld [vmem:[%s4158_s8 + $0x18] sm:$0xff] }
 0xabe   :  { %3196 = vmatprep.mubr.msk.f32.mxu1 %vm127_vm0, %v1656_v53 }
 0xabf   :  { %3197 = vmatmul.mubr.msk.f32.vlgmr.msra.gmra.mrb[20].mxu1 %vm127_vm0, %v1657_v54 }
 0xac0   :  { %3435 = vmatpush3.bf16.msra.mxu1 %v3432_v44  ;;  %3212 = vmatprep.mubr.msk.f32.mxu1 %vm127_vm0, %v3695_v7 }
 0xac1   :  { %3437 = vmatprep.subr.bf16.mxu1 %v3436_v55 }
 0xac4   :  { %3439 = vmatpush3.bf16.msra.mxu1 %v3436_v55 }
 0xac5   :  { %3441 = vmatprep.subr.bf16.mxu1 %v3440_v58 }
 0xac7   :  { %3213 = vmatmul.mubr.msk.f32.vlgmr.msra.gmra.mrb[22].mxu1 %vm127_vm0, %v3723_v15 }
 0xac8   :  { %3443 = vmatpush3.bf16.msra.mxu1 %v3440_v58  ;;  %3223 = vmatprep.mubr.msk.f32.mxu1 %vm127_vm0, %v3688_v5 }
 0xac9   :  { %3445 = vmatprep.subr.bf16.mxu1 %v3444_v61 }
 0xacc   :  { %3447 = vmatpush3.bf16.msra.mxu1 %v3444_v61  ;;  %v2691_v61 = vld [vmem:[%s4159_s9] ss:$0 sm:$0xff] }
 0xacd   :  { %v115_v62 = vadd.f32 %v2691_v61, %v3723_v15 }
 0xacf   :  { %3224 = vmatmul.mubr.msk.f32.vlgmr.msra.gmra.mrb[24].mxu1 %vm127_vm0, %v3714_v14 }
 0xad0   :  { %3226 = vmatprep.mubr.msk.f32.mxu1 %vm127_vm0, %v3695_v7 }
 0xad3   :  { %3227 = vmatmul.mubr.msk.f32.gmra.mrb[26].mxu1 %vm127_vm0, %v3723_v15 }
 0xb92   :  { %v3198_v63 = vpop.f32.mrb[20].mxu1 }
 0xb93   :  { %v1730_v0 = vpop.f32.mrb[21].mxu1 }
 0xb94   :  { %3201 = vmatprep.mubr.msk.f32.mxu0 %vm407_vm1, %v1730_v0 }
 0xb95   :  { %3202 = vmatmul.mubr.msk.f32.vlgmr.msra.gmra.mrb[8].mxu0 %vm407_vm1, %v3198_v63  ;;  %v114_v63 = vadd.f32 %v2691_v61, %v3695_v7 }
 0xb96   :  { %3237 = vmatprep.mubr.msk.f32.mxu0 %vm127_vm0, %v3688_v5  ;;  %3451 = vmatpush3.bf16.msra.mxu0 %v3448_v24  ;;  %v2530_v24 = vld [vmem:[%s4162_s12] sm:$0xff] }
 0xb97   :  { %3453 = vmatprep.subr.bf16.mxu0 %v3452_v25 }
 0xb9a   :  { %v3214_v2 = vpop.f32.mrb[22].mxu1  ;;  %3455 = vmatpush3.bf16.msra.mxu0 %v3452_v25  ;;  %v2532_v25 = vld [vmem:[%s4162_s12 + $0x10] sm:$0xff] }
 0xb9b   :  { %v1903_v3 = vpop.f32.mrb[23].mxu1  ;;  %v1909_v19 = vadd.f32 %v3214_v2, %v2798_v1 }
 0xb9c   :  { %v1904_v4 = vadd.f32 %v2798_v1, %v1903_v3 }
 0xb9d   :  { %3238 = vmatmul.mubr.msk.f32.vlgmr.msra.gmra.mrb[22].mxu0 %vm127_vm0, %v3714_v14 }
 0xb9e   :  { %3251 = vmatprep.mubr.msk.f32.mxu1 %vm407_vm1, %v1904_v4  ;;  %3240 = vmatprep.mubr.msk.f32.mxu0 %vm127_vm0, %v3695_v7 }
 0xba1   :  { %3241 = vmatmul.mubr.msk.f32.gmra.mrb[24].mxu0 %vm127_vm0, %v3723_v15 }
 0xba2   :  { %v3225_v8 = vpop.f32.mrb[24].mxu1 }
 0xba3   :  { %v1997_v9 = vadd.f32 %v3225_v8, %v2806_v6  ;;  %v1991_v10 = vpop.f32.mrb[25].mxu1 }
 0xba4   :  { %v1992_v11 = vadd.f32 %v2806_v6, %v1991_v10 }
 0xba6   :  { %v3456_v12 = vpack.c.bf16 %v1997_v9, %v1992_v11  ;;  %v3228_v13 = vpop.f32.mrb[26].mxu1 }
 0xba7   :  { %v2007_v5 = vadd.f32 %v3228_v13, %v2806_v6  ;;  %v2001_v16 = vpop.f32.mrb[27].mxu1 }
 0xba8   :  { %3458 = vmatprep.subr.msk.bf16.mxu1 %vm3739_vm2, %v3456_v12  ;;  %v2002_v17 = vadd.f32 %v2806_v6, %v2001_v16 }
 0xba9   :  { %3461 = vmatpush3.bf16.xpose.msk.msra.mxu1 %vm3739_vm2, %v3456_v12 }
 0xbaa   :  { %v3462_v18 = vpack.c.bf16 %v2007_v5, %v2002_v17  ;;  %v2436_v17 = vld [vmem:[%s4160_s10] sm:$0xff] }
 0xbac   :  { %3464 = vmatprep.subr.msk.bf16.mxu1 %vm3739_vm2, %v3462_v18 }
 0xbb1   :  { %3467 = vmatpush3.bf16.xpose.msk.msra.mxu1 %vm3739_vm2, %v3462_v18  ;;  %v2437_v18 = vld [vmem:[%s4160_s10 + $0x8] sm:$0xff] }
 0xbb8   :  { %3252 = vmatmul.mubr.msk.f32.vlgmr.msra.gmra.mrb[28].mxu1 %vm407_vm1, %v1909_v19  ;;  %v3476_v19 = vpack.c.bf16 %v2437_v18, %v2436_v17 }
 0xc70   :  { %v3239_v14 = vpop.f32.mrb[22].mxu0 }
 0xc71   :  { %v2095_v41 = vadd.f32 %v3239_v14, %v2816_v40  ;;  %v2089_v42 = vpop.f32.mrb[23].mxu0 }
 0xc72   :  { %v2090_v43 = vadd.f32 %v2816_v40, %v2089_v42 }
 0xc74   :  { %v3468_v44 = vpack.c.bf16 %v2095_v41, %v2090_v43  ;;  %v3242_v45 = vpop.f32.mrb[24].mxu0 }
 0xc75   :  { %v2099_v47 = vpop.f32.mrb[25].mxu0  ;;  %v2105_v49 = vadd.f32 %v3242_v45, %v2816_v40  ;;  %v2536_v45 = vld [vmem:[%s4162_s12 + $0x30] sm:$0xff] }
 0xc76   :  { %v2100_v50 = vadd.f32 %v2816_v40, %v2099_v47  ;;  %3469 = vmatprep.subr.bf16.mxu0 %v3468_v44  ;;  %v2833_v40 = vld [vmem:[%s4165_s15] ss:$0 sm:$0xff]  ;;  %v2537_v47 = vld [vmem:[%s4162_s12 + $0x38] sm:$0xff] }
 0xc77   :  { %3471 = vmatpush3.bf16.msra.mxu0 %v3468_v44 }
 0xc78   :  { %v3472_v51 = vpack.c.bf16 %v2105_v49, %v2100_v50  ;;  %v3496_v49 = vpack.c.bf16 %v2537_v47, %v2536_v45  ;;  %v2834_v50 = vld [vmem:[%s4161_s11] ss:$0 sm:$0xff] }
 0xc7a   :  { %3473 = vmatprep.subr.bf16.mxu0 %v3472_v51 }
 0xc7b   :  { %3475 = vmatpush3.bf16.msra.mxu0 %v3472_v51 }
 0xc7c   :  { %3265 = vmatprep.subr.mxu0 %v2829_v52 }
 0xc8b   :  { %v3253_v26 = vpop.f32.mrb[28].mxu1 }
 0xc8c   :  { %v2202_v27 = vsel %vm3777_vm4, %v3253_v26, -1e+30  ;;  %v2192_v28 = vpop.f32.mrb[29].mxu1  ;;  %v3484_v26 = vpack.c.bf16 %v2531_v22, %v2530_v24  ;;  %v2841_v22 = vld [vmem:[%s4167_s17] ss:$0 sm:$0xff] }
 0xc8d   :  { %v2201_v29 = vsel %vm3773_vm3, %v2192_v28, -1e+30  ;;  %v2206_v30 = vsel %vm127_vm0, %v2202_v27, -inf }
 0xc8e   :  { %2207 = vmax.xlane.f32.xlu1 %v2206_v30  ;;  %v2203_v31 = vsel %vm127_vm0, %v2201_v29, -inf  ;;  %v2535_v30 = vld [vmem:[%s4162_s12 + $0x28] sm:$0xff]  ;;  %3485 = vmatprep.subr.bf16.mxu1 %v3484_v26 }
 0xc8f   :  { %2204 = vmax.xlane.f32.xlu0 %v2203_v31  ;;  %3487 = vmatpush3.bf16.msra.mxu1 %v3484_v26 }
 0xd1b   :  { %v2208_v32 = vpop.xlane.xlu1 %2207 }
 0xd1c   :  { %v2210_v33 = vsub.f32 %v2202_v27, %v2208_v32  ;;  %v2205_v34 = vpop.xlane.xlu0 %2204  ;;  %v2533_v27 = vld [vmem:[%s4162_s12 + $0x18] sm:$0xff] }
 0xd1d   :  { %v2209_v35 = vsub.f32 %v2201_v29, %v2205_v34  ;;  %v3488_v28 = vpack.c.bf16 %v2533_v27, %v2532_v25  ;;  %v2534_v29 = vld [vmem:[%s4162_s12 + $0x20] sm:$0xff] }
 0xd1e   :  { %v2213_v36 = vmul.f32 1.442695, %v2210_v33  ;;  %v3492_v31 = vpack.c.bf16 %v2535_v30, %v2534_v29 }
 0xd1f   :  { %v2211_v37 = vmul.f32 1.442695, %v2209_v35  ;;  %3489 = vmatprep.subr.bf16.mxu1 %v3488_v28 }
 0xd20   :  { %3535 = vpow2.f32 %v2213_v36  ;;  %3491 = vmatpush3.bf16.msra.mxu1 %v3488_v28 }
 0xd21   :  { %3537 = vpow2.f32 %v2211_v37  ;;  %3493 = vmatprep.subr.bf16.mxu1 %v3492_v31 }
 0xd24   :  { %3495 = vmatpush3.bf16.msra.mxu1 %v3492_v31 }
 0xd25   :  { %3497 = vmatprep.subr.bf16.mxu1 %v3496_v49 }
 0xd28   :  { %3499 = vmatpush3.bf16.msra.mxu1 %v3496_v49 }
 0xd2a   :  { %v3536_v48 = vpop.eup %3535 }
 0xd2b   :  { %v3538_v38 = vpop.eup %3537  ;;  %v2218_v46 = vsel %vm127_vm0, %v3536_v48, 0.0 }
 0xd2c   :  { %2219 = vadd.xlane.f32.xlu1 %v2218_v46  ;;  %v2215_v39 = vsel %vm127_vm0, %v3538_v38, 0.0 }
 0xd2d   :  { %2216 = vadd.xlane.f32.xlu0 %v2215_v39 }
 0xdb9   :  { %v2220_v53 = vpop.xlane.xlu1 %2219 }
 0xdba   :  { %3539 = vrcp.f32 %v2220_v53  ;;  %v2217_v54 = vpop.xlane.xlu0 %2216 }
 0xdbb   :  { %3541 = vrcp.f32 %v2217_v54 }
 0xdc4   :  { %v3540_v55 = vpop.eup %3539 }
 0xdc5   :  { %v3542_v56 = vpop.eup %3541  ;;  %v2224_v58 = vmul.f32 %v3540_v55, %v3536_v48  ;;  %v2832_v48 = vld [vmem:[%s4164_s14] ss:$0 sm:$0xff] }
 0xdc6   :  { %v2223_v57 = vmul.f32 %v3542_v56, %v3538_v38 }
 0xdc8   :  { %3262 = vmatprep.mubr.msk.f32.mxu0 %vm127_vm0, %v2223_v57  ;;  %v2837_v57 = vld [vmem:[%s4163_s13] ss:$0 sm:$0xff] }
 0xdc9   :  { %3263 = vmatmul.mubr.msk.f32.vlgmr.msra.gmra.mrb[26].mxu0 %vm127_vm0, %v2224_v58 }
 0xdca   :  { %3266 = vmatpush3.msra.mxu0 %v2829_v52 }
 0xdcb   :  { %3477 = vmatprep.subr.bf16.mxu0 %v3476_v19 }
 0xe9c   :  { %v3264_v59 = vpop.f32.mrb[26].mxu0 }
 0xe9d   :  { %v2297_v60 = vpop.f32.mrb[27].mxu0 }
 0xe9e   :  { %3267 = vmatprep.mubr.msk.f32.mxu0 %vm407_vm1, %v2297_v60 }
 0xe9f   :  { %3268 = vmatmul.mubr.msk.f32.vlgmr.msra.gmra.mrb[8].mxu0 %vm407_vm1, %v3264_v59 }
 0xea0   :  { %3479 = vmatpush3.bf16.msra.mxu0 %v3476_v19 }
 0xea1   :  { %3481 = vmatprep.subr.bf16.mxu0 %v3480_v23 }
 0xea4   :  { %3483 = vmatpush3.bf16.msra.mxu0 %v3480_v23 }
 0xf72   :  { %v3269_v0 = vpop.f32.mrb[8].mxu0 }
 0xf73   :  { %v3500_v1 = vadd.f32 %v3269_v0, %v115_v62  ;;  %v2380_v2 = vpop.f32.mrb[9].mxu0 }
 0xf74   :  { %v3501_v3 = vadd.f32 %v2380_v2, %v114_v63 }
 0xf75   :  { %v2396_v4 = vsel %vm127_vm0, %v3500_v1, 0.0 }
 0xf76   :  { %2397 = vadd.xlane.f32.xlu1 %v2396_v4  ;;  %v2393_v6 = vsel %vm127_vm0, %v3501_v3, 0.0 }
 0xf77   :  { %2394 = vadd.xlane.f32.xlu0 %v2393_v6 }
0x1003   :  { %v2398_v8 = vpop.xlane.xlu1 %2397 }
0x1004   :  { %v2401_v9 = vmul.f32 0.03125, %v2398_v8  ;;  %v2395_v10 = vpop.xlane.xlu0 %2394 }
0x1005   :  { %v2400_v11 = vmul.f32 0.03125, %v2395_v10 }
0x1006   :  { %v2403_v12 = vsub.f32 %v3500_v1, %v2401_v9 }
0x1007   :  { %v2402_v13 = vsub.f32 %v3501_v3, %v2400_v11 }
0x1008   :  { %v2405_v5 = vmul.f32 %v2403_v12, %v2403_v12 }
0x1009   :  { %v2404_v15 = vmul.f32 %v2402_v13, %v2402_v13 }
0x100a   :  { %v2409_v7 = vsel %vm127_vm0, %v2405_v5, 0.0 }
0x100b   :  { %2410 = vadd.xlane.f32.xlu1 %v2409_v7  ;;  %v2406_v16 = vsel %vm127_vm0, %v2404_v15, 0.0 }
0x100c   :  { %2407 = vadd.xlane.f32.xlu0 %v2406_v16 }
0x1098   :  { %v2411_v14 = vpop.xlane.xlu1 %2410 }
0x1099   :  { %v2413_v32 = vmul.f32 0.03125, %v2411_v14  ;;  %v2408_v33 = vpop.xlane.xlu0 %2407 }
0x109a   :  { %v2412_v34 = vmul.f32 0.03125, %v2408_v33 }
0x109b   :  { %v2415_v35 = vadd.f32 1e-05, %v2413_v32 }
0x109c   :  { %v2414_v36 = vadd.f32 1e-05, %v2412_v34 }
0x109d   :  { %3543 = vrsqrt.f32 %v2415_v35 }
0x109e   :  { %3545 = vrsqrt.f32 %v2414_v36 }
0x10a7   :  { %v3544_v37 = vpop.eup %3543 }
0x10a8   :  { %v3546_v38 = vpop.eup %3545  ;;  %v2419_v46 = vmul.f32 %v3544_v37, %v2403_v12 }
0x10a9   :  { %v2418_v39 = vmul.f32 %v3546_v38, %v2402_v13 }
0x10aa   :  { %v2427_v41 = vmul.f32 %v2832_v48, %v2419_v46 }
0x10ab   :  { %v2426_v42 = vmul.f32 %v2832_v48, %v2418_v39 }
0x10ac   :  { %v2435_v44 = vadd.f32 %v2833_v40, %v2427_v41 }
0x10ad   :  { %v2434_v43 = vadd.f32 %v2833_v40, %v2426_v42 }
0x10af   :  { %3278 = vmatprep.mubr.msk.f32.mxu0 %vm127_vm0, %v2434_v43 }
0x10b0   :  { %3279 = vmatmul.mubr.msk.f32.vlgmr.msra.gmra.mrb[28].mxu0 %vm127_vm0, %v2435_v44 }
0x1183   :  { %v3280_v51 = vpop.f32.mrb[28].mxu0 }
0x1184   :  { %v2525_v52 = vadd.f32 %v3280_v51, %v2834_v50  ;;  %v2519_v53 = vpop.f32.mrb[29].mxu0 }
0x1185   :  { %v2520_v54 = vadd.f32 %v2834_v50, %v2519_v53 }
0x1186   :  { %v2529_v56 = vmax.f32 %v2525_v52, 0.0 }
0x1187   :  { %v2528_v55 = vmax.f32 %v2520_v54, 0.0 }
0x1189   :  { %3297 = vmatprep.mubr.msk.f32.mxu1 %vm2545_vm5, %v2528_v55 }
0x118a   :  { %3298 = vmatmul.mubr.msk.f32.vlgmr.msra.gmra.mrb[30].mxu1 %vm2545_vm5, %v2529_v56 }
0x125d   :  { %v3299_v58 = vpop.f32.mrb[30].mxu1 }
0x125e   :  { %v2624_v59 = vadd.f32 %v3299_v58, %v2837_v57  ;;  %v2618_v60 = vpop.f32.mrb[31].mxu1 }
0x125f   :  { %v2619_v61 = vadd.f32 %v2837_v57, %v2618_v60 }
0x1260   :  { %v2628_v62 = vadd.f32 %v2624_v59, %v2435_v44 }
0x1261   :  { %v2627_v63 = vadd.f32 %v2619_v61, %v2434_v43 }
0x1262   :  { %v2634_v0 = vsel %vm127_vm0, %v2628_v62, 0.0 }
0x1263   :  { %2635 = vadd.xlane.f32.xlu1 %v2634_v0  ;;  %v2631_v1 = vsel %vm127_vm0, %v2627_v63, 0.0 }
0x1264   :  { %2632 = vadd.xlane.f32.xlu0 %v2631_v1 }
0x12f0   :  { %v2636_v2 = vpop.xlane.xlu1 %2635 }
0x12f1   :  { %v2638_v3 = vmul.f32 0.03125, %v2636_v2  ;;  %v2633_v4 = vpop.xlane.xlu0 %2632 }
0x12f2   :  { %v2637_v6 = vmul.f32 0.03125, %v2633_v4 }
0x12f3   :  { %v2640_v8 = vsub.f32 %v2628_v62, %v2638_v3 }
0x12f4   :  { %v2639_v9 = vsub.f32 %v2627_v63, %v2637_v6 }
0x12f5   :  { %v2642_v10 = vmul.f32 %v2640_v8, %v2640_v8 }
0x12f6   :  { %v2641_v11 = vmul.f32 %v2639_v9, %v2639_v9 }
0x12f7   :  { %v2646_v12 = vsel %vm127_vm0, %v2642_v10, 0.0 }
0x12f8   :  { %2647 = vadd.xlane.f32.xlu1 %v2646_v12  ;;  %v2643_v13 = vsel %vm127_vm0, %v2641_v11, 0.0 }
0x12f9   :  { %2644 = vadd.xlane.f32.xlu0 %v2643_v13 }
0x1385   :  { %v2648_v5 = vpop.xlane.xlu1 %2647 }
0x1386   :  { %v2650_v15 = vmul.f32 0.03125, %v2648_v5  ;;  %v2645_v7 = vpop.xlane.xlu0 %2644 }
0x1387   :  { %v2649_v16 = vmul.f32 0.03125, %v2645_v7 }
0x1388   :  { %v2652_v17 = vadd.f32 1e-05, %v2650_v15 }
0x1389   :  { %v2651_v18 = vadd.f32 1e-05, %v2649_v16 }
0x138a   :  { %3547 = vrsqrt.f32 %v2652_v17 }
0x138b   :  { %3549 = vrsqrt.f32 %v2651_v18 }
0x1394   :  { %v3548_v19 = vpop.eup %3547 }
0x1395   :  { %v3550_v21 = vpop.eup %3549  ;;  %v2656_v23 = vmul.f32 %v3548_v19, %v2640_v8 }
0x1396   :  { %v2655_v24 = vmul.f32 %v3550_v21, %v2639_v9 }
0x1397   :  { %v2664_v25 = vmul.f32 %v2840_v20, %v2656_v23 }
0x1398   :  { %v2663_v26 = vmul.f32 %v2840_v20, %v2655_v24 }
0x1399   :  { %v2672_v27 = vadd.f32 %v2841_v22, %v2664_v25 }
0x139a   :  { %v2671_v28 = vadd.f32 %v2841_v22, %v2663_v26 }
0x139b   :  { %2674 = vst.msk [vmem:[#allocation2 + $0x8] sm:$0xff] %vm127_vm0, %v2672_v27 }
0x139c   :  { %2673 = vst.msk [vmem:[#allocation2] sm:$0xff] %vm127_vm0, %v2671_v28 }
0x139d   :  { %3562 = shalt.err (!%p3559_p4)
}
0x139e   :  { %s3563_s26 = scalar_lea.hbm %s4168_s18, 256 }
0x139f   :  { %p3564_p5 = scmp.ne.s32.totalorder %s4168_s18, %s3563_s26  ;;  %p3567_p6 = scmp.lt.u32.totalorder %s3563_s26, %s4168_s18 }
0x13a1   :  { %p3569_p7 = pnand %p3567_p6, %p3564_p5 }
0x13a3   :  { %3572 = shalt.err (!%p3569_p7)
}
0x13a4   :  { %s3576_s10 = smov 128   ;;  %s3577_s6 = smov 8  }
0x13a5   :  { %2686 = dma.vmem_to_hbm [thread:$0]  %s2681_s5, 256, %s4168_s18, [#allocation3], %s3576_s10, %s3576_s10, %s3577_s6  }
0x13a6   :  { %3573 = dma.done.wait [#allocation3], 256  }
0x13a7   :  { %3574 = vsyncadd [#allocation3], 4294967040 }
0x13a8   :  { %2690 = vsyncpa [#allocation3], 1 }

</bundles_post_ra>
